<compile_context>
chip_gen: v7x
topology: tpu7x:2x2x1
jax: 0.10.0
libtpu: 0.0.40
codegen_flags: <defaults>
</compile_context>

<pallas_src>
import functools

import numpy as np
import jax
import jax.numpy as jnp
from jax import lax
from jax.experimental import pallas as pl
from jax.experimental.pallas import tpu as pltpu


def _round_up(x, m):
    return ((x + m - 1) // m) * m


# ---------------------------------------------------------------------------
# Shared tile body: (re)compute the deconv output tile for grid step (n, t).
#   rows  = (jh, jw')   jw' in [0, Wp); jw' >= W rows are junk (dropped later)
#   lanes = (ph, pw, oc) sub-pixel output phases x output channels
# ---------------------------------------------------------------------------
def _deconv_tile(x_ref, b_ref, *, rt, w_pad, dh, dw):
    base = pl.multiple_of(pl.program_id(1) * rt, 8)
    lo = b_ref.shape[-1]
    acc = jnp.zeros((rt, lo), jnp.float32)
    for e in range(dh):              # unrolled: dh*dw small GEMMs, f32 accum
        for d in range(dw):
            a = x_ref[pl.ds(base + e * w_pad + d, rt), :]
            acc = acc + jnp.dot(a, b_ref[e, d],
                                preferred_element_type=jnp.float32)
    return acc


# ---------------------------------------------------------------------------
# Kernel 1: per-tile partial BN statistics (no activation-sized HBM writes).
# ---------------------------------------------------------------------------
def _stats_kernel(x_ref, b_ref, psum_ref, psq_ref, *, rt, w_pad, w_valid,
                  dh, dw):
    acc = _deconv_tile(x_ref, b_ref, rt=rt, w_pad=w_pad, dh=dh, dw=dw)
    jw = lax.broadcasted_iota(jnp.int32, (rt, 1), 0) % w_pad
    acc = jnp.where(jw < w_valid, acc, 0.0)      # exclude junk (padding) rows
    psum_ref[...] = jnp.sum(acc, axis=0, keepdims=True)
    psq_ref[...] = jnp.sum(acc * acc, axis=0, keepdims=True)


# ---------------------------------------------------------------------------
# Kernel 2: recompute tile from the resident input + fused BN affine + ReLU.
# ---------------------------------------------------------------------------
def _affine_kernel(x_ref, b_ref, scale_ref, shift_ref, o_ref, *, rt, w_pad,
                   dh, dw, act):
    acc = _deconv_tile(x_ref, b_ref, rt=rt, w_pad=w_pad, dh=dh, dw=dw)
    y = acc * scale_ref[...] + shift_ref[...]
    if act == "relu":
        y = jnp.maximum(y, 0.0)
    o_ref[...] = y


def deconv_bn_layer(x_nchw, weight, gamma, beta, *, stride, act="relu",
                    eps=1e-5, vmem_budget_bytes=4 * 1024 * 1024):
    """ConvTranspose2d(k, s, padding=(k-1)//2, bias=False, groups=1)
       + BatchNorm2d (training-mode batch stats) + activation.

    x_nchw : (N, Cin, H, W)     weight : (Cin, Cout, k, k)   (PyTorch layouts)
    gamma, beta : (Cout,)
    """
    N, Cin, H, W = x_nchw.shape
    Cin_w, Cout, k, k2 = weight.shape
    assert k == k2 and Cin == Cin_w
    s = int(stride)
    p = (k - 1) // 2
    # TODO(synk): specialised to the SAST-FPN deconv geometry (k % s == 0 and
    # k - 2p == s, e.g. kernel_size=4 / stride=2); other configs need a
    # different halo / phase bookkeeping.
    assert k % s == 0 and k - 2 * p == s, "unsupported deconv geometry"
    Hout, Wout = H * s, W * s
    halo = (k - 1 - p) // s
    c = p + s * halo                       # shift constant in padded coords

    # --- static (shift e, phase ph) -> kernel-tap selection table (tiny) ----
    taps = [(ph + c - t) // s for ph in range(s) for t in range(k)
            if (ph + c - t) % s == 0]
    dmax = max(taps)
    assert min(taps) >= 0 and dmax <= 2 * halo, "unsupported padding geometry"
    D = dmax + 1
    sel = np.zeros((D, s, k), np.float32)
    for ph in range(s):
        for t in range(k):
            if (ph + c - t) % s == 0:
                sel[(ph + c - t) // s, ph, t] = 1.0

    LO = s * s * Cout
    # B[e, d, ic, (ph, pw, oc)] : per (row-shift, col-shift) weight matrices
    bmat = jnp.einsum("ehk,dwl,iokl->edihwo", sel, sel,
                      weight.astype(jnp.float32)).reshape(D, D, Cin, LO)

    # --- resident zero-padded input slab: (N, RX, Cin), rows = (ih, iw) -----
    x_nhwc = jnp.transpose(x_nchw, (0, 2, 3, 1)).astype(jnp.float32)
    x_pad = jnp.pad(x_nhwc, ((0, 0), (halo, halo), (halo, halo), (0, 0)))
    Hp, Wp = H + 2 * halo, W + 2 * halo
    RX = _round_up(max((H + dmax) * Wp + dmax, Hp * Wp), 8)
    x_flat = x_pad.reshape(N, Hp * Wp, Cin)
    x_flat = jnp.pad(x_flat, ((0, 0), (0, RX - Hp * Wp), (0, 0)))

    # --- tile-size selection from a per-generation-safe VMEM budget ---------
    cands = [tj for tj in range(1, H + 1)
             if H % tj == 0 and (tj * Wp) % 8 == 0]
    if not cands:
        TJ = H                                  # single tile: block == full dim
    else:
        fits = [tj for tj in cands if 3 * tj * Wp * LO * 4 <= vmem_budget_bytes]
        cands = fits or [min(cands)]
        multi = [tj for tj in cands if H // tj >= 2]   # >=2 steps for v7x TCs
        TJ = max(multi or cands)
    T = H // TJ
    RT = TJ * Wp

    grid = (N, T)
    x_spec = pl.BlockSpec((None, RX, Cin), lambda n, t: (n, 0, 0))
    b_spec = pl.BlockSpec((D, D, Cin, LO), lambda n, t: (0, 0, 0, 0))
    stat_spec = pl.BlockSpec((None, None, 1, LO), lambda n, t: (n, t, 0, 0))
    vec_spec = pl.BlockSpec((1, LO), lambda n, t: (0, 0))
    params = pltpu.CompilerParams(
        dimension_semantics=("parallel", "parallel"))

    # --- pass 1: partial batch statistics (tiny outputs only) ---------------
    psum, psq = pl.pallas_call(
        functools.partial(_stats_kernel, rt=RT, w_pad=Wp, w_valid=W,
                          dh=D, dw=D),
        out_shape=(jax.ShapeDtypeStruct((N, T, 1, LO), jnp.float32),
                   jax.ShapeDtypeStruct((N, T, 1, LO), jnp.float32)),
        grid=grid,
        in_specs=[x_spec, b_spec],
        out_specs=(stat_spec, stat_spec),
        compiler_params=params,
    )(x_flat, bmat)

    # --- host: (Cout,)-sized reduction -> fused BN scale / shift ------------
    # TODO(synk): E[x^2]-E[x]^2 can cancel for large-mean activations; switch
    # to a two-pass / Welford reduction if tolerances ever tighten.
    count = float(N * Hout * Wout)
    ch_sum = psum.sum(axis=(0, 1, 2)).reshape(s * s, Cout).sum(axis=0)
    ch_sq = psq.sum(axis=(0, 1, 2)).reshape(s * s, Cout).sum(axis=0)
    mean = ch_sum / count
    var = jnp.maximum(ch_sq / count - mean * mean, 0.0)     # biased, train mode
    scale = gamma.astype(jnp.float32) * lax.rsqrt(var + eps)
    shift = beta.astype(jnp.float32) - mean * scale
    scale_l = jnp.tile(scale, s * s).reshape(1, LO)
    shift_l = jnp.tile(shift, s * s).reshape(1, LO)

    # --- pass 2: recompute tile + fused affine + ReLU, single HBM store -----
    y_phased = pl.pallas_call(
        functools.partial(_affine_kernel, rt=RT, w_pad=Wp, dh=D, dw=D, act=act),
        out_shape=jax.ShapeDtypeStruct((N, H * Wp, LO), jnp.float32),
        grid=grid,
        in_specs=[x_spec, b_spec, vec_spec, vec_spec],
        out_specs=pl.BlockSpec((None, RT, LO), lambda n, t: (n, t, 0)),
        compiler_params=params,
    )(x_flat, bmat, scale_l, shift_l)

    # TODO(synk): the sub-pixel un-shuffle + NHWC->NCHW conversion stays as ONE
    # fused XLA slice/transpose pass (the module's NCHW interface needs a
    # layout pass anyway); keep NHWC end-to-end across the FPN to drop it.
    y6 = y_phased.reshape(N, H, Wp, s, s, Cout)[:, :, :W]
    out = jnp.transpose(y6, (0, 5, 1, 3, 2, 4)).reshape(N, Cout, Hout, Wout)
    return out


# ---------------------------------------------------------------------------
# Pure-JAX reference (mirrors PyTorch DeConvBNLayer.forward, training mode)
# ---------------------------------------------------------------------------
def _reference(x, weight, gamma, beta, *, stride, act, eps=1e-5):
    k = weight.shape[2]
    p = (k - 1) // 2
    w_oihw = jnp.transpose(weight[:, :, ::-1, ::-1], (1, 0, 2, 3))
    y = lax.conv_general_dilated(
        x.astype(jnp.float32), w_oihw.astype(jnp.float32),
        window_strides=(1, 1),
        padding=[(k - 1 - p, k - 1 - p)] * 2,
        lhs_dilation=(stride, stride),
        dimension_numbers=("NCHW", "OIHW", "NCHW"),
        precision=lax.Precision.HIGHEST)
    mean = y.mean(axis=(0, 2, 3), keepdims=True)
    var = ((y - mean) ** 2).mean(axis=(0, 2, 3), keepdims=True)
    y = (y - mean) / jnp.sqrt(var + eps) * gamma.reshape(1, -1, 1, 1) \
        + beta.reshape(1, -1, 1, 1)
    if act == "relu":
        y = jnp.maximum(y, 0.0)
    return y


if __name__ == "__main__":
    # DeConvBNLayer(in_channels=4, out_channels=8, kernel_size=4, stride=2,
    #               groups=1, if_act=True, act='relu')  -- as used in SAST FPN
    N, Cin, H, W = 2, 4, 16, 16
    Cout, k, stride = 8, 4, 2

    key = jax.random.PRNGKey(0)
    kx, kw, kg, kb = jax.random.split(key, 4)
    x = jax.random.normal(kx, (N, Cin, H, W), jnp.float32)
    weight = 0.1 * jax.random.normal(kw, (Cin, Cout, k, k), jnp.float32)
    gamma = 1.0 + 0.1 * jax.random.normal(kg, (Cout,), jnp.float32)
    beta = 0.1 * jax.random.normal(kb, (Cout,), jnp.float32)

    out = deconv_bn_layer(x, weight, gamma, beta, stride=stride, act="relu")
    out = jax.block_until_ready(out)

    ref = _reference(x, weight, gamma, beta, stride=stride, act="relu")
    Hout = (H - 1) * stride - 2 * ((k - 1) // 2) + k
    Wout = (W - 1) * stride - 2 * ((k - 1) // 2) + k
    assert out.shape == (N, Cout, Hout, Wout)
    assert jnp.allclose(out, ref, rtol=2e-2, atol=2e-2), \
        f"max abs err {jnp.max(jnp.abs(out - ref))}"

    print("KERNEL_OK")
</pallas_src>

<mosaic_0001>
module attributes {stable_mosaic.version = 11 : i64} {
  func.func @_stats_kernel(%arg0: i32, %arg1: i32, %arg2: memref<1x328x4xf32, #tpu.memory_space<vmem>>, %arg3: memref<3x3x4x32xf32, #tpu.memory_space<vmem>>, %arg4: memref<1x1x1x32xf32, #tpu.memory_space<vmem>>, %arg5: memref<1x1x1x32xf32, #tpu.memory_space<vmem>>) attributes {dimension_semantics = [#tpu.dimension_semantics<parallel>, #tpu.dimension_semantics<parallel>], iteration_bounds = array<i64: 2, 2>, scalar_prefetch = 0 : i64, scratch_operands = 0 : i64, tpu.core_type = #tpu.core_type<tc>, window_params = [{transform_indices = @transform_0, window_bounds = array<i64: 1, 328, 4>}, {pipeline_mode = #tpu.pipeline_mode<synchronous>, transform_indices = @transform_1, window_bounds = array<i64: 3, 3, 4, 32>}, {transform_indices = @transform_2, window_bounds = array<i64: 1, 1, 1, 32>}, {transform_indices = @transform_3, window_bounds = array<i64: 1, 1, 1, 32>}]} {
    %c144_i32 = arith.constant 144 : i32
    %0 = arith.muli %arg1, %c144_i32 : i32
    %1 = tpu.assume_multiple %0, 8 : i32
    %cst = arith.constant 0.000000e+00 : f32
    %2 = vector.broadcast %cst : f32 to vector<144x32xf32>
    %c0_i32 = arith.constant 0 : i32
    %3 = arith.addi %1, %c0_i32 : i32
    %c0_i32_0 = arith.constant 0 : i32
    %4 = arith.addi %3, %c0_i32_0 : i32
    %c0 = arith.constant 0 : index
    %5 = arith.index_cast %4 : i32 to index
    %c0_1 = arith.constant 0 : index
    %6 = vector.load %arg2[%c0, %5, %c0_1] : memref<1x328x4xf32, #tpu.memory_space<vmem>>, vector<1x144x4xf32>
    %7 = vector.shape_cast %6 : vector<1x144x4xf32> to vector<144x4xf32>
    %c0_2 = arith.constant 0 : index
    %c0_3 = arith.constant 0 : index
    %c0_4 = arith.constant 0 : index
    %c0_5 = arith.constant 0 : index
    %8 = vector.load %arg3[%c0_2, %c0_3, %c0_4, %c0_5] : memref<3x3x4x32xf32, #tpu.memory_space<vmem>>, vector<1x1x4x32xf32>
    %9 = vector.shape_cast %8 : vector<1x1x4x32xf32> to vector<4x32xf32>
    %cst_6 = arith.constant dense<0.000000e+00> : vector<144x32xf32>
    %10 = tpu.matmul %7, %9, %cst_6 {dimension_numbers = #tpu.dot_dimension_numbers<[1], [0], [0], [1], [0, 0, 1, 1], [], []>} : vector<144x4xf32>, vector<4x32xf32>, vector<144x32xf32> -> vector<144x32xf32>
    %11 = arith.addf %2, %10 : vector<144x32xf32>
    %c0_i32_7 = arith.constant 0 : i32
    %12 = arith.addi %1, %c0_i32_7 : i32
    %c1_i32 = arith.constant 1 : i32
    %13 = arith.addi %12, %c1_i32 : i32
    %c0_8 = arith.constant 0 : index
    %14 = arith.index_cast %13 : i32 to index
    %c0_9 = arith.constant 0 : index
    %15 = vector.load %arg2[%c0_8, %14, %c0_9] : memref<1x328x4xf32, #tpu.memory_space<vmem>>, vector<1x144x4xf32>
    %16 = vector.shape_cast %15 : vector<1x144x4xf32> to vector<144x4xf32>
    %c0_10 = arith.constant 0 : index
    %c1 = arith.constant 1 : index
    %c0_11 = arith.constant 0 : index
    %c0_12 = arith.constant 0 : index
    %17 = vector.load %arg3[%c0_10, %c1, %c0_11, %c0_12] : memref<3x3x4x32xf32, #tpu.memory_space<vmem>>, vector<1x1x4x32xf32>
    %18 = vector.shape_cast %17 : vector<1x1x4x32xf32> to vector<4x32xf32>
    %cst_13 = arith.constant dense<0.000000e+00> : vector<144x32xf32>
    %19 = tpu.matmul %16, %18, %cst_13 {dimension_numbers = #tpu.dot_dimension_numbers<[1], [0], [0], [1], [0, 0, 1, 1], [], []>} : vector<144x4xf32>, vector<4x32xf32>, vector<144x32xf32> -> vector<144x32xf32>
    %20 = arith.addf %11, %19 : vector<144x32xf32>
    %c0_i32_14 = arith.constant 0 : i32
    %21 = arith.addi %1, %c0_i32_14 : i32
    %c2_i32 = arith.constant 2 : i32
    %22 = arith.addi %21, %c2_i32 : i32
    %c0_15 = arith.constant 0 : index
    %23 = arith.index_cast %22 : i32 to index
    %c0_16 = arith.constant 0 : index
    %24 = vector.load %arg2[%c0_15, %23, %c0_16] : memref<1x328x4xf32, #tpu.memory_space<vmem>>, vector<1x144x4xf32>
    %25 = vector.shape_cast %24 : vector<1x144x4xf32> to vector<144x4xf32>
    %c0_17 = arith.constant 0 : index
    %c2 = arith.constant 2 : index
    %c0_18 = arith.constant 0 : index
    %c0_19 = arith.constant 0 : index
    %26 = vector.load %arg3[%c0_17, %c2, %c0_18, %c0_19] : memref<3x3x4x32xf32, #tpu.memory_space<vmem>>, vector<1x1x4x32xf32>
    %27 = vector.shape_cast %26 : vector<1x1x4x32xf32> to vector<4x32xf32>
    %cst_20 = arith.constant dense<0.000000e+00> : vector<144x32xf32>
    %28 = tpu.matmul %25, %27, %cst_20 {dimension_numbers = #tpu.dot_dimension_numbers<[1], [0], [0], [1], [0, 0, 1, 1], [], []>} : vector<144x4xf32>, vector<4x32xf32>, vector<144x32xf32> -> vector<144x32xf32>
    %29 = arith.addf %20, %28 : vector<144x32xf32>
    %c18_i32 = arith.constant 18 : i32
    %30 = arith.addi %1, %c18_i32 : i32
    %c0_i32_21 = arith.constant 0 : i32
    %31 = arith.addi %30, %c0_i32_21 : i32
    %c0_22 = arith.constant 0 : index
    %32 = arith.index_cast %31 : i32 to index
    %c0_23 = arith.constant 0 : index
    %33 = vector.load %arg2[%c0_22, %32, %c0_23] : memref<1x328x4xf32, #tpu.memory_space<vmem>>, vector<1x144x4xf32>
    %34 = vector.shape_cast %33 : vector<1x144x4xf32> to vector<144x4xf32>
    %c1_24 = arith.constant 1 : index
    %c0_25 = arith.constant 0 : index
    %c0_26 = arith.constant 0 : index
    %c0_27 = arith.constant 0 : index
    %35 = vector.load %arg3[%c1_24, %c0_25, %c0_26, %c0_27] : memref<3x3x4x32xf32, #tpu.memory_space<vmem>>, vector<1x1x4x32xf32>
    %36 = vector.shape_cast %35 : vector<1x1x4x32xf32> to vector<4x32xf32>
    %cst_28 = arith.constant dense<0.000000e+00> : vector<144x32xf32>
    %37 = tpu.matmul %34, %36, %cst_28 {dimension_numbers = #tpu.dot_dimension_numbers<[1], [0], [0], [1], [0, 0, 1, 1], [], []>} : vector<144x4xf32>, vector<4x32xf32>, vector<144x32xf32> -> vector<144x32xf32>
    %38 = arith.addf %29, %37 : vector<144x32xf32>
    %c18_i32_29 = arith.constant 18 : i32
    %39 = arith.addi %1, %c18_i32_29 : i32
    %c1_i32_30 = arith.constant 1 : i32
    %40 = arith.addi %39, %c1_i32_30 : i32
    %c0_31 = arith.constant 0 : index
    %41 = arith.index_cast %40 : i32 to index
    %c0_32 = arith.constant 0 : index
    %42 = vector.load %arg2[%c0_31, %41, %c0_32] : memref<1x328x4xf32, #tpu.memory_space<vmem>>, vector<1x144x4xf32>
    %43 = vector.shape_cast %42 : vector<1x144x4xf32> to vector<144x4xf32>
    %c1_33 = arith.constant 1 : index
    %c1_34 = arith.constant 1 : index
    %c0_35 = arith.constant 0 : index
    %c0_36 = arith.constant 0 : index
    %44 = vector.load %arg3[%c1_33, %c1_34, %c0_35, %c0_36] : memref<3x3x4x32xf32, #tpu.memory_space<vmem>>, vector<1x1x4x32xf32>
    %45 = vector.shape_cast %44 : vector<1x1x4x32xf32> to vector<4x32xf32>
    %cst_37 = arith.constant dense<0.000000e+00> : vector<144x32xf32>
    %46 = tpu.matmul %43, %45, %cst_37 {dimension_numbers = #tpu.dot_dimension_numbers<[1], [0], [0], [1], [0, 0, 1, 1], [], []>} : vector<144x4xf32>, vector<4x32xf32>, vector<144x32xf32> -> vector<144x32xf32>
    %47 = arith.addf %38, %46 : vector<144x32xf32>
    %c18_i32_38 = arith.constant 18 : i32
    %48 = arith.addi %1, %c18_i32_38 : i32
    %c2_i32_39 = arith.constant 2 : i32
    %49 = arith.addi %48, %c2_i32_39 : i32
    %c0_40 = arith.constant 0 : index
    %50 = arith.index_cast %49 : i32 to index
    %c0_41 = arith.constant 0 : index
    %51 = vector.load %arg2[%c0_40, %50, %c0_41] : memref<1x328x4xf32, #tpu.memory_space<vmem>>, vector<1x144x4xf32>
    %52 = vector.shape_cast %51 : vector<1x144x4xf32> to vector<144x4xf32>
    %c1_42 = arith.constant 1 : index
    %c2_43 = arith.constant 2 : index
    %c0_44 = arith.constant 0 : index
    %c0_45 = arith.constant 0 : index
    %53 = vector.load %arg3[%c1_42, %c2_43, %c0_44, %c0_45] : memref<3x3x4x32xf32, #tpu.memory_space<vmem>>, vector<1x1x4x32xf32>
    %54 = vector.shape_cast %53 : vector<1x1x4x32xf32> to vector<4x32xf32>
    %cst_46 = arith.constant dense<0.000000e+00> : vector<144x32xf32>
    %55 = tpu.matmul %52, %54, %cst_46 {dimension_numbers = #tpu.dot_dimension_numbers<[1], [0], [0], [1], [0, 0, 1, 1], [], []>} : vector<144x4xf32>, vector<4x32xf32>, vector<144x32xf32> -> vector<144x32xf32>
    %56 = arith.addf %47, %55 : vector<144x32xf32>
    %c36_i32 = arith.constant 36 : i32
    %57 = arith.addi %1, %c36_i32 : i32
    %c0_i32_47 = arith.constant 0 : i32
    %58 = arith.addi %57, %c0_i32_47 : i32
    %c0_48 = arith.constant 0 : index
    %59 = arith.index_cast %58 : i32 to index
    %c0_49 = arith.constant 0 : index
    %60 = vector.load %arg2[%c0_48, %59, %c0_49] : memref<1x328x4xf32, #tpu.memory_space<vmem>>, vector<1x144x4xf32>
    %61 = vector.shape_cast %60 : vector<1x144x4xf32> to vector<144x4xf32>
    %c2_50 = arith.constant 2 : index
    %c0_51 = arith.constant 0 : index
    %c0_52 = arith.constant 0 : index
    %c0_53 = arith.constant 0 : index
    %62 = vector.load %arg3[%c2_50, %c0_51, %c0_52, %c0_53] : memref<3x3x4x32xf32, #tpu.memory_space<vmem>>, vector<1x1x4x32xf32>
    %63 = vector.shape_cast %62 : vector<1x1x4x32xf32> to vector<4x32xf32>
    %cst_54 = arith.constant dense<0.000000e+00> : vector<144x32xf32>
    %64 = tpu.matmul %61, %63, %cst_54 {dimension_numbers = #tpu.dot_dimension_numbers<[1], [0], [0], [1], [0, 0, 1, 1], [], []>} : vector<144x4xf32>, vector<4x32xf32>, vector<144x32xf32> -> vector<144x32xf32>
    %65 = arith.addf %56, %64 : vector<144x32xf32>
    %c36_i32_55 = arith.constant 36 : i32
    %66 = arith.addi %1, %c36_i32_55 : i32
    %c1_i32_56 = arith.constant 1 : i32
    %67 = arith.addi %66, %c1_i32_56 : i32
    %c0_57 = arith.constant 0 : index
    %68 = arith.index_cast %67 : i32 to index
    %c0_58 = arith.constant 0 : index
    %69 = vector.load %arg2[%c0_57, %68, %c0_58] : memref<1x328x4xf32, #tpu.memory_space<vmem>>, vector<1x144x4xf32>
    %70 = vector.shape_cast %69 : vector<1x144x4xf32> to vector<144x4xf32>
    %c2_59 = arith.constant 2 : index
    %c1_60 = arith.constant 1 : index
    %c0_61 = arith.constant 0 : index
    %c0_62 = arith.constant 0 : index
    %71 = vector.load %arg3[%c2_59, %c1_60, %c0_61, %c0_62] : memref<3x3x4x32xf32, #tpu.memory_space<vmem>>, vector<1x1x4x32xf32>
    %72 = vector.shape_cast %71 : vector<1x1x4x32xf32> to vector<4x32xf32>
    %cst_63 = arith.constant dense<0.000000e+00> : vector<144x32xf32>
    %73 = tpu.matmul %70, %72, %cst_63 {dimension_numbers = #tpu.dot_dimension_numbers<[1], [0], [0], [1], [0, 0, 1, 1], [], []>} : vector<144x4xf32>, vector<4x32xf32>, vector<144x32xf32> -> vector<144x32xf32>
    %74 = arith.addf %65, %73 : vector<144x32xf32>
    %c36_i32_64 = arith.constant 36 : i32
    %75 = arith.addi %1, %c36_i32_64 : i32
    %c2_i32_65 = arith.constant 2 : i32
    %76 = arith.addi %75, %c2_i32_65 : i32
    %c0_66 = arith.constant 0 : index
    %77 = arith.index_cast %76 : i32 to index
    %c0_67 = arith.constant 0 : index
    %78 = vector.load %arg2[%c0_66, %77, %c0_67] : memref<1x328x4xf32, #tpu.memory_space<vmem>>, vector<1x144x4xf32>
    %79 = vector.shape_cast %78 : vector<1x144x4xf32> to vector<144x4xf32>
    %c2_68 = arith.constant 2 : index
    %c2_69 = arith.constant 2 : index
    %c0_70 = arith.constant 0 : index
    %c0_71 = arith.constant 0 : index
    %80 = vector.load %arg3[%c2_68, %c2_69, %c0_70, %c0_71] : memref<3x3x4x32xf32, #tpu.memory_space<vmem>>, vector<1x1x4x32xf32>
    %81 = vector.shape_cast %80 : vector<1x1x4x32xf32> to vector<4x32xf32>
    %cst_72 = arith.constant dense<0.000000e+00> : vector<144x32xf32>
    %82 = tpu.matmul %79, %81, %cst_72 {dimension_numbers = #tpu.dot_dimension_numbers<[1], [0], [0], [1], [0, 0, 1, 1], [], []>} : vector<144x4xf32>, vector<4x32xf32>, vector<144x32xf32> -> vector<144x32xf32>
    %83 = arith.addf %74, %82 : vector<144x32xf32>
    %84 = tpu.iota {dimensions = array<i32: 0>} : vector<144x1xi32>
    %c18_i32_73 = arith.constant 18 : i32
    %c0_i32_74 = arith.constant 0 : i32
    %85 = arith.cmpi eq, %c18_i32_73, %c0_i32_74 : i32
    %c1_i32_75 = arith.constant 1 : i32
    %86 = arith.select %85, %c1_i32_75, %c18_i32_73 : i32
    %87 = vector.broadcast %86 : i32 to vector<144x1xi32>
    %88 = arith.remsi %84, %87 : vector<144x1xi32>
    %c0_i32_76 = arith.constant 0 : i32
    %89 = vector.broadcast %c0_i32_76 : i32 to vector<144x1xi32>
    %90 = arith.cmpi ne, %88, %89 : vector<144x1xi32>
    %c0_i32_77 = arith.constant 0 : i32
    %91 = vector.broadcast %c0_i32_77 : i32 to vector<144x1xi32>
    %92 = arith.cmpi slt, %88, %91 : vector<144x1xi32>
    %c0_i32_78 = arith.constant 0 : i32
    %93 = arith.cmpi slt, %86, %c0_i32_78 : i32
    %94 = vector.broadcast %93 : i1 to vector<144x1xi1>
    %95 = vector.broadcast %94 : vector<144x1xi1> to vector<144x1xi1>
    %96 = arith.xori %92, %95 : vector<144x1xi1>
    %97 = arith.andi %96, %90 : vector<144x1xi1>
    %98 = vector.broadcast %86 : i32 to vector<144x1xi32>
    %99 = arith.addi %88, %98 : vector<144x1xi32>
    %100 = arith.select %97, %99, %88 : vector<144x1xi1>, vector<144x1xi32>
    %c16_i32 = arith.constant 16 : i32
    %101 = vector.broadcast %c16_i32 : i32 to vector<144x1xi32>
    %102 = arith.cmpi slt, %100, %101 : vector<144x1xi32>
    %cst_79 = arith.constant 0.000000e+00 : f32
    %103 = vector.shape_cast %102 : vector<144x1xi1> to vector<144x1xi1>
    %104 = vector.broadcast %103 : vector<144x1xi1> to vector<144x32xi1>
    %105 = vector.broadcast %cst_79 : f32 to vector<144x32xf32>
    %106 = arith.select %104, %83, %105 : vector<144x32xi1>, vector<144x32xf32>
    %cst_80 = arith.constant dense<0.000000e+00> : vector<32xf32>
    %107 = vector.multi_reduction <add>, %106, %cst_80 [0] : vector<144x32xf32> to vector<32xf32>
    %108 = vector.shape_cast %107 : vector<32xf32> to vector<1x32xf32>
    %c0_81 = arith.constant 0 : index
    %c0_82 = arith.constant 0 : index
    %c0_83 = arith.constant 0 : index
    %c0_84 = arith.constant 0 : index
    %109 = vector.load %arg4[%c0_81, %c0_82, %c0_83, %c0_84] : memref<1x1x1x32xf32, #tpu.memory_space<vmem>>, vector<1x1x1x32xf32>
    %110 = vector.shape_cast %109 : vector<1x1x1x32xf32> to vector<1x32xf32>
    %111 = vector.shape_cast %108 : vector<1x32xf32> to vector<1x1x1x32xf32>
    tpu.vector_store %arg4[%c0_81, %c0_82, %c0_83, %c0_84], %111 {strides = array<i32>} : memref<1x1x1x32xf32, #tpu.memory_space<vmem>>, vector<1x1x1x32xf32>,
    %112 = arith.mulf %106, %106 : vector<144x32xf32>
    %cst_85 = arith.constant dense<0.000000e+00> : vector<32xf32>
    %113 = vector.multi_reduction <add>, %112, %cst_85 [0] : vector<144x32xf32> to vector<32xf32>
    %114 = vector.shape_cast %113 : vector<32xf32> to vector<1x32xf32>
    %c0_86 = arith.constant 0 : index
    %c0_87 = arith.constant 0 : index
    %c0_88 = arith.constant 0 : index
    %c0_89 = arith.constant 0 : index
    %115 = vector.load %arg5[%c0_86, %c0_87, %c0_88, %c0_89] : memref<1x1x1x32xf32, #tpu.memory_space<vmem>>, vector<1x1x1x32xf32>
    %116 = vector.shape_cast %115 : vector<1x1x1x32xf32> to vector<1x32xf32>
    %117 = vector.shape_cast %114 : vector<1x32xf32> to vector<1x1x1x32xf32>
    tpu.vector_store %arg5[%c0_86, %c0_87, %c0_88, %c0_89], %117 {strides = array<i32>} : memref<1x1x1x32xf32, #tpu.memory_space<vmem>>, vector<1x1x1x32xf32>,
    return
  }
  func.func @transform_0(%arg0: i32, %arg1: i32) -> (i32, i32, i32) {
    %c0_i32 = arith.constant 0 : i32
    %c0_i32_0 = arith.constant 0 : i32
    %c0_i32_1 = arith.constant 0 : i32
    return %arg0, %c0_i32, %c0_i32_0 : i32, i32, i32
  }
  func.func @transform_1(%arg0: i32, %arg1: i32) -> (i32, i32, i32, i32) {
    %c0_i32 = arith.constant 0 : i32
    %c0_i32_0 = arith.constant 0 : i32
    %c0_i32_1 = arith.constant 0 : i32
    %c0_i32_2 = arith.constant 0 : i32
    %c0_i32_3 = arith.constant 0 : i32
    return %c0_i32, %c0_i32_0, %c0_i32_1, %c0_i32_2 : i32, i32, i32, i32
  }
  func.func @transform_2(%arg0: i32, %arg1: i32) -> (i32, i32, i32, i32) {
    %c0_i32 = arith.constant 0 : i32
    %c0_i32_0 = arith.constant 0 : i32
    %c0_i32_1 = arith.constant 0 : i32
    return %arg0, %arg1, %c0_i32, %c0_i32_0 : i32, i32, i32, i32
  }
  func.func @transform_3(%arg0: i32, %arg1: i32) -> (i32, i32, i32, i32) {
    %c0_i32 = arith.constant 0 : i32
    %c0_i32_0 = arith.constant 0 : i32
    %c0_i32_1 = arith.constant 0 : i32
    return %arg0, %arg1, %c0_i32, %c0_i32_0 : i32, i32, i32, i32
  }
}

</mosaic_0001>

<bundles_post_ra>
// kernel: tpu_custom_call.1
= control target key start
LH: loop header
LB: loop body
LE: loop exit
PB: predicated region body
PF: predicated region fallthrough
CT: control target
= control target key end

     0   :  { %9 = vsyncpa [#allocation3], 0  ;;  %s5509_s0 = inlined_call_operand.vmem [shape: f32[2,328,4], index: 0, kind: input, shape index: {}]   ;;  %s5510_s1 = inlined_call_operand.vmem [shape: f32[3,3,4,32], index: 1, kind: input, shape index: {}]   ;;  %s5511_s2 = inlined_call_operand.hbm [shape: f32[2,2,1,32], index: 2, kind: output, shape index: {0}]   ;;  %s5512_s3 = inlined_call_operand.hbm [shape: f32[2,2,1,32], index: 3, kind: output, shape index: {1}]  }
   0x1   :  { %11 = vsyncpa [#allocation3 + $0x1], 0 }
   0x2   :  { %12 = vsyncpa [#allocation5], 0 }
   0x3   :  { %14 = vsyncpa [#allocation5 + $0x1], 0  ;;  %s4244_s12 = smov 0   ;;  %s4246_s13 = smov 0  }
   0x4   :  { %s4248_s14 = smov 0   ;;  %s4250_s15 = smov 0  }
   0x5   :  { %s4252_s16 = smov 0   ;;  %s4254_s17 = smov 0  }
   0x6   :  { %s4256_s18 = smov 0   ;;  %s4258_s19 = smov 0  }
   0x7 LB: > { %s3068_s20 = sadd.s32 4294967295, %s4220_s19   ;;  %s3069_s21 = sadd.s32 4294967294, %s4220_s19   ;;  %s4220_s19 = sphi %s4258_s19, %s20_s19   ;;  %s4216_s18 = sphi %s4256_s18, %s5629_s18   ;;  %s4212_s17 = sphi %s4254_s17, %s5628_s17   ;;  %s4208_s16 = sphi %s4252_s16, %s5627_s16   ;;  %s4204_s15 = sphi %s4250_s15, %s5626_s15   ;;  %s4200_s14 = sphi %s4248_s14, %s5625_s14   ;;  %s4196_s13 = sphi %s4246_s13, %s5624_s13   ;;  %s4192_s12 = sphi %s4244_s12, %s5623_s12  }
   0x8   : > { %s29_s22 = sadd.s32 1, %s4212_s17  ;;  %s32_s23 = sadd.s32 1, %s4216_s18 }
   0x9   : > { %p30_p0 = scmp.ge.s32.totalorder %s29_s22, 2  ;;  %p98_p1 = scmp.ne.s32.totalorder %s4200_s14, %s4196_s13 }
   0xa   : > { %p99_p2 = scmp.eq.s32.totalorder %s3068_s20, 3  ;;  %p104_p5 = scmp.ne.s32.totalorder %s4196_s13, %s4192_s12 }
   0xb   : > { %s5631_s22 = smov (%p30_p0, %s29_s22), 0  ;;  %s5633_s23 = smov (!%p30_p0, %s32_s23), %s4216_s18 }
   0xc   : > { %s84_s24 = ssub.s32 %s4212_s17, %s5631_s22  ;;  %p4295_p3 = por %p99_p2, %p98_p1 }
   0xd   : > { %p34_p4 = scmp.ge.s32.totalorder %s5633_s23, 2  ;;  %p105_p6 = scmp.eq.s32.totalorder %s3069_s21, 3 }
   0xe   : > { %p3072_p7 = scmp.ge.s32.totalorder %s4220_s19, 1  ;;  %p162_p9 = scmp.lt.s32.totalorder %s4220_s19, 5 }
   0xf   : > { %s5635_s23 = smov (%p34_p4, %s5633_s23), 0  ;;  %p4304_p8 = por %p105_p6, %p104_p5 }
  0x10   : > { %s83_s27 = ssub.s32 %s4216_s18, %s5635_s23  ;;  %s88_s28 = sadd.s32 1, %s4200_s14 }
  0x11   : > { %s85_s29 = sor.u32 %s84_s24, %s83_s27  ;;  %p163_p10 = pnand %p3072_p7, %p162_p9 }
  0x12   : > { %p86_p11 = scmp.eq.s32.totalorder %s85_s29, 0  ;;  %vm292_vm0 = vcmask (!%p163_p10), 1043456   ;;  %v4318_v0 = vld [vmem:[%s5510_s1 + $0x10] sm:$0xf] (!%p163_p10)  ;;  %v3092_v1 = vld [vmem:[%s5510_s1 + $0x4] sm:$0xf] (!%p163_p10) }
  0x13   : > { %166 = sbr.rel (%p163_p10) target bundleno = 465 (0x1d1), region = 28  ;;  %p189_p12 = scmp.lt.s32.totalorder (!%p163_p10), %s4208_s16, 1  ;;  %3690 = vmatprep.subr.msk.mxu0 (!%p163_p10), %vm292_vm0, %v4318_v0  ;;  %3574 = vmatprep.subr.msk.mxu1 (!%p163_p10), %vm292_vm0, %v3092_v1  ;;  %v3263_v2 = vld [vmem:[%s5510_s1 + $0x14] sm:$0xf] (!%p163_p10)  ;;  %v214_v3 = vld [vmem:[%s5510_s1] sm:$0xf] (!%p163_p10) }
  0x14   : > { %s4313_s30 = scalar_select %p86_p11, %s4200_s14, %s88_s28  }
  0x15   : > { %3691 = vmatpush3.msk.msra.mxu0 (!%p163_p10), %vm292_vm0, %v4318_v0  ;;  %3575 = vmatpush3.msk.msra.mxu1 (!%p163_p10), %vm292_vm0, %v3092_v1  ;;  %s194_s21 = smul.u32 (!%p163_p10), 144, %s4204_s15  ;;  %vm237_vm1 = vcmask (!%p163_p10), 31744   ;;  %v3301_v10 = vld [vmem:[%s5510_s1 + $0x18] sm:$0xf] (!%p163_p10)  ;;  %v4361_v11 = vld [vmem:[%s5510_s1 + $0x8] sm:$0xf] (!%p163_p10) }
  0x16   : > { %3719 = vmatprep.subr.msk.mxu0 (!%p163_p10), %vm292_vm0, %v3263_v2  ;;  %3603 = vmatprep.subr.msk.mxu1 (!%p163_p10), %vm292_vm0, %v214_v3  ;;  %v4411_v32 = vld [vmem:[%s5510_s1 + $0x1c] sm:$0xf] (!%p163_p10)  ;;  %v4477_v49 = vld [vmem:[%s5510_s1 + $0xc] sm:$0xf] (!%p163_p10)  ;;  %s3397_s27 = sshll.u32 (!%p163_p10), %s4208_s16, 1  ;;  %s5412_s28 = sand.u32 (!%p163_p10), 1, %s4196_s13  }
  0x17   : > { %s182_s5 = scalar_lea.vmem (!%p163_p10), [#allocation2], %s5412_s28 }
  0x18   : > { %s2929_s6 = sshll.u32 (!%p163_p10), %s182_s5, 4  ;;  %s5424_s6 = int_to_ptr.vmem [resolvable:$true] %s2929_s6 }
  0x1a   : > { %s190_s20 = scalar_select %p189_p12, %s4208_s16, 1 }
  0x1b   : > { %s188_s16 = scalar_lea.vmem [#allocation4], %s5412_s28 }
  0x1c   : > { %s3981_s24 = smul.u32 328, %s190_s20  ;;  %s2944_s7 = sshll.u32 %s188_s16, 4  ;;  %s5431_s7 = int_to_ptr.vmem [resolvable:$true] %s2944_s7 }
  0x1e   : > { %s193_s29 = scalar_lea.vmem %s5509_s0, %s3981_s24  ;;  %s4094_s24 = scalar_lea.vmem %s5424_s6, 16 }
  0x1f   : > { %s4343_s4 = scalar_lea.vmem %s193_s29, %s194_s21  ;;  %s2925_s29 = sadd.s32 %s4204_s15, %s3397_s27 }
  0x20   : > { %v3074_v4 = vld [vmem:[%s4343_s4 + $0x1] sm:$0xff]  ;;  %v3207_v5 = vld [vmem:[%s4343_s4 + $0x13] sm:$0xff]  ;;  %v3075_v6 = vld [vmem:[%s4343_s4 + $0x9] sm:$0xff]  ;;  %s2911_s21 = scalar_lea.sflag [#allocation3], %s5412_s28  ;;  %p4095_p13 = scmp.ne.s32.totalorder %s5424_s6, %s4094_s24 }
  0x21   : > { %3576 = vmatprep.mubr.msk.f32.mxu1 %vm237_vm1, %v3074_v4  ;;  %3692 = vmatprep.mubr.msk.f32.mxu0 %vm237_vm1, %v3207_v5  ;;  %v3208_v7 = vld [vmem:[%s4343_s4 + $0x1b] sm:$0xff]  ;;  %v3076_v8 = vld [vmem:[%s4343_s4 + $0x11] sm:$0xff]  ;;  %v3209_v9 = vld [vmem:[%s4343_s4 + $0x23] sm:$0xff]  ;;  %s4222_s27 = smov [#allocation2]  }
  0x22   : > { %3577 = vmatmul.mubr.msk.f32.vlgmr.msra.gmra.mrb[0].mxu1 %vm237_vm1, %v3075_v6  ;;  %3693 = vmatmul.mubr.msk.f32.vlgmr.msra.gmra.mrb[0].mxu0 %vm237_vm1, %v3208_v7  ;;  %v3077_v12 = vld [vmem:[%s4343_s4 + $0x19] sm:$0xff]  ;;  %v3210_v13 = vld [vmem:[%s4343_s4 + $0x2b] sm:$0xff]  ;;  %v3078_v14 = vld [vmem:[%s4343_s4 + $0x21] sm:$0xff]  ;;  %p4096_p0 = pnand %p4095_p13, %p4295_p3 }
  0x23   : > { %3720 = vmatpush3.msk.msra.mxu0 %vm292_vm0, %v3263_v2  ;;  %3579 = vmatprep.mubr.msk.f32.mxu1 %vm237_vm1, %v3076_v8  ;;  %v3211_v15 = vld [vmem:[%s4343_s4 + $0x33] sm:$0xff]  ;;  %v3079_v16 = vld [vmem:[%s4343_s4 + $0x29] sm:$0xff]  ;;  %v3212_v17 = vld [vmem:[%s4343_s4 + $0x3b] sm:$0xff] }
  0x24   : > { %3695 = vmatprep.mubr.msk.f32.mxu0 %vm237_vm1, %v3209_v9  ;;  %3604 = vmatpush3.msk.msra.mxu1 %vm292_vm0, %v214_v3  ;;  %v3080_v18 = vld [vmem:[%s4343_s4 + $0x31] sm:$0xff]  ;;  %v3213_v19 = vld [vmem:[%s4343_s4 + $0x43] sm:$0xff]  ;;  %v3081_v20 = vld [vmem:[%s4343_s4 + $0x39] sm:$0xff]  ;;  %p4097_p1 = pneg %p4096_p0 }
  0x25   : > { %3748 = vmatprep.subr.msk.mxu0 %vm292_vm0, %v3301_v10  ;;  %3632 = vmatprep.subr.msk.mxu1 %vm292_vm0, %v4361_v11  ;;  %v3214_v21 = vld [vmem:[%s4343_s4 + $0x4b] sm:$0xff]  ;;  %v3082_v22 = vld [vmem:[%s4343_s4 + $0x41] sm:$0xff]  ;;  %v3215_v23 = vld [vmem:[%s4343_s4 + $0x53] sm:$0xff] }
  0x26   : > { %3580 = vmatmul.mubr.msk.f32.gmra.mrb[2].mxu1 %vm237_vm1, %v3077_v12  ;;  %3696 = vmatmul.mubr.msk.f32.gmra.mrb[2].mxu0 %vm237_vm1, %v3210_v13  ;;  %v3083_v24 = vld [vmem:[%s4343_s4 + $0x49] sm:$0xff]  ;;  %v3216_v25 = vld [vmem:[%s4343_s4 + $0x5b] sm:$0xff]  ;;  %v3084_v26 = vld [vmem:[%s4343_s4 + $0x51] sm:$0xff] }
  0x27   : > { %3582 = vmatprep.mubr.msk.f32.mxu1 %vm237_vm1, %v3078_v14  ;;  %3698 = vmatprep.mubr.msk.f32.mxu0 %vm237_vm1, %v3211_v15  ;;  %v3245_v27 = vld [vmem:[%s4343_s4 + $0x14] sm:$0xff]  ;;  %v3246_v29 = vld [vmem:[%s4343_s4 + $0x1c] sm:$0xff]  ;;  %v4406_v31 = vld [vmem:[%s4343_s4 + $0x24] sm:$0xff] }
  0x28   : > { %v3085_v28 = vld [vmem:[%s4343_s4 + $0x59] sm:$0xff]  ;;  %v3086_v30 = vld [vmem:[%s4343_s4 + $0x61] sm:$0xff]  ;;  %v3087_v33 = vld [vmem:[%s4343_s4 + $0x69] sm:$0xff] }
  0x29   : > { %v4419_v34 = vld [vmem:[%s4343_s4 + $0x2c] sm:$0xff]  ;;  %v4425_v36 = vld [vmem:[%s4343_s4 + $0x34] sm:$0xff]  ;;  %v4437_v38 = vld [vmem:[%s4343_s4 + $0x3c] sm:$0xff] }
  0x2a   : > { %3583 = vmatmul.mubr.msk.f32.gmra.mrb[4].mxu1 %vm237_vm1, %v3079_v16  ;;  %3699 = vmatmul.mubr.msk.f32.gmra.mrb[4].mxu0 %vm237_vm1, %v3212_v17  ;;  %v3088_v35 = vld [vmem:[%s4343_s4 + $0x71] sm:$0xff]  ;;  %v3089_v37 = vld [vmem:[%s4343_s4 + $0x79] sm:$0xff]  ;;  %v3090_v39 = vld [vmem:[%s4343_s4 + $0x81] sm:$0xff] }
  0x2b   : > { %3585 = vmatprep.mubr.msk.f32.mxu1 %vm237_vm1, %v3080_v18  ;;  %3701 = vmatprep.mubr.msk.f32.mxu0 %vm237_vm1, %v3213_v19  ;;  %v4441_v40 = vld [vmem:[%s4343_s4 + $0x44] sm:$0xff]  ;;  %v4451_v42 = vld [vmem:[%s4343_s4 + $0x4c] sm:$0xff]  ;;  %v4455_v44 = vld [vmem:[%s4343_s4 + $0x54] sm:$0xff] }
  0x2c   : > { %v3091_v41 = vld [vmem:[%s4343_s4 + $0x89] sm:$0xff]  ;;  %v196_v43 = vld [vmem:[%s4343_s4] sm:$0xff]  ;;  %v199_v50 = vld [vmem:[%s4343_s4 + $0x18] sm:$0xff] }
  0x2d   : > { %v197_v45 = vld [vmem:[%s4343_s4 + $0x8] sm:$0xff]  ;;  %v4465_v46 = vld [vmem:[%s4343_s4 + $0x5c] sm:$0xff]  ;;  %v198_v47 = vld [vmem:[%s4343_s4 + $0x10] sm:$0xff] }
  0x2e   : > { %3586 = vmatmul.mubr.msk.f32.gmra.mrb[6].mxu1 %vm237_vm1, %v3081_v20  ;;  %3702 = vmatmul.mubr.msk.f32.gmra.mrb[6].mxu0 %vm237_vm1, %v3214_v21  ;;  %v4469_v48 = vld [vmem:[%s4343_s4 + $0x64] sm:$0xff]  ;;  %v3256_v51 = vld [vmem:[%s4343_s4 + $0x6c] sm:$0xff]  ;;  %v3257_v53 = vld [vmem:[%s4343_s4 + $0x74] sm:$0xff] }
  0x2f   : > { %3588 = vmatprep.mubr.msk.f32.mxu1 %vm237_vm1, %v3082_v22  ;;  %3704 = vmatprep.mubr.msk.f32.mxu0 %vm237_vm1, %v3215_v23  ;;  %v200_v52 = vld [vmem:[%s4343_s4 + $0x20] sm:$0xff]  ;;  %v201_v54 = vld [vmem:[%s4343_s4 + $0x28] sm:$0xff]  ;;  %v202_v56 = vld [vmem:[%s4343_s4 + $0x30] sm:$0xff] }
  0x30   : > { %v3258_v55 = vld [vmem:[%s4343_s4 + $0x7c] sm:$0xff]  ;;  %v3259_v57 = vld [vmem:[%s4343_s4 + $0x84] sm:$0xff]  ;;  %v3260_v59 = vld [vmem:[%s4343_s4 + $0x8c] sm:$0xff] }
  0x31   : > { %v203_v58 = vld [vmem:[%s4343_s4 + $0x38] sm:$0xff]  ;;  %v204_v60 = vld [vmem:[%s4343_s4 + $0x40] sm:$0xff]  ;;  %v205_v62 = vld [vmem:[%s4343_s4 + $0x48] sm:$0xff] }
  0x32   : > { %3589 = vmatmul.mubr.msk.f32.gmra.mrb[8].mxu1 %vm237_vm1, %v3083_v24  ;;  %3705 = vmatmul.mubr.msk.f32.gmra.mrb[8].mxu0 %vm237_vm1, %v3216_v25  ;;  %v3261_v61 = vld [vmem:[%s4343_s4 + $0x94] sm:$0xff]  ;;  %v3262_v63 = vld [vmem:[%s4343_s4 + $0x9c] sm:$0xff]  ;;  %v209_v5 = vld [vmem:[%s4343_s4 + $0x68] sm:$0xff] }
  0x33   : > { %3591 = vmatprep.mubr.msk.f32.mxu1 %vm237_vm1, %v3084_v26  ;;  %3721 = vmatprep.mubr.msk.f32.mxu0 %vm237_vm1, %v3245_v27  ;;  %v206_v1 = vld [vmem:[%s4343_s4 + $0x50] sm:$0xff]  ;;  %v207_v2 = vld [vmem:[%s4343_s4 + $0x58] sm:$0xff]  ;;  %v208_v3 = vld [vmem:[%s4343_s4 + $0x60] sm:$0xff] }
  0x34   : > { %v4523_v4 = vld [vmem:[%s5510_s1 + $0x20] sm:$0xf]  ;;  %v210_v6 = vld [vmem:[%s4343_s4 + $0x70] sm:$0xff]  ;;  %v211_v7 = vld [vmem:[%s4343_s4 + $0x78] sm:$0xff] }
  0x35   : > { %v212_v8 = vld [vmem:[%s4343_s4 + $0x80] sm:$0xff]  ;;  %v213_v9 = vld [vmem:[%s4343_s4 + $0x88] sm:$0xff]  ;;  %v4561_v12 = vld [vmem:[%s4343_s4 + $0x12] sm:$0xff] }
  0x36   : > { %3592 = vmatmul.mubr.msk.f32.gmra.mrb[10].mxu1 %vm237_vm1, %v3085_v28  ;;  %3722 = vmatmul.mubr.msk.f32.vlgmr.msra.gmra.mrb[0].mxu0 %vm237_vm1, %v3246_v29  ;;  %v4569_v13 = vld [vmem:[%s4343_s4 + $0x1a] sm:$0xff]  ;;  %v4574_v14 = vld [vmem:[%s4343_s4 + $0x22] sm:$0xff]  ;;  %v3136_v15 = vld [vmem:[%s4343_s4 + $0x2a] sm:$0xff] }
  0x37   : > { %3749 = vmatpush3.msk.msra.mxu0 %vm292_vm0, %v3301_v10  ;;  %3594 = vmatprep.mubr.msk.f32.mxu1 %vm237_vm1, %v3086_v30  ;;  %v3131_v10 = vld [vmem:[%s4343_s4 + $0x2] sm:$0xff]  ;;  %v4586_v16 = vld [vmem:[%s4343_s4 + $0x32] sm:$0xff]  ;;  %v3138_v17 = vld [vmem:[%s4343_s4 + $0x3a] sm:$0xff] }
  0x38   : > { %3724 = vmatprep.mubr.msk.f32.mxu0 %vm237_vm1, %v4406_v31  ;;  %3777 = vmatprep.subr.msk.mxu0 %vm292_vm0, %v4411_v32  ;;  %v4595_v18 = vld [vmem:[%s4343_s4 + $0x42] sm:$0xff]  ;;  %v3140_v20 = vld [vmem:[%s4343_s4 + $0x4a] sm:$0xff]  ;;  %v3141_v22 = vld [vmem:[%s4343_s4 + $0x52] sm:$0xff] }
  0x39   : > { %v3299_v19 = vld [vmem:[%s4343_s4 + $0xa4] sm:$0xff]  ;;  %v3300_v21 = vld [vmem:[%s4343_s4 + $0xac] sm:$0xff]  ;;  %v3142_v24 = vld [vmem:[%s4343_s4 + $0x5a] sm:$0xff] }
  0x3a   : > { %3595 = vmatmul.mubr.msk.f32.gmra.mrb[12].mxu1 %vm237_vm1, %v3087_v33  ;;  %3725 = vmatmul.mubr.msk.f32.gmra.mrb[2].mxu0 %vm237_vm1, %v4419_v34  ;;  %v3321_v23 = vld [vmem:[%s4343_s4 + $0x25] sm:$0xff]  ;;  %v3322_v25 = vld [vmem:[%s4343_s4 + $0x2d] sm:$0xff]  ;;  %v3323_v27 = vld [vmem:[%s4343_s4 + $0x35] sm:$0xff] }
  0x3b   : > { %3597 = vmatprep.mubr.msk.f32.mxu1 %vm237_vm1, %v3088_v35  ;;  %3727 = vmatprep.mubr.msk.f32.mxu0 %vm237_vm1, %v4425_v36  ;;  %v3143_v26 = vld [vmem:[%s4343_s4 + $0x62] sm:$0xff]  ;;  %v3144_v28 = vld [vmem:[%s4343_s4 + $0x6a] sm:$0xff]  ;;  %v3145_v30 = vld [vmem:[%s4343_s4 + $0x72] sm:$0xff] }
  0x3c   : > { %v3324_v29 = vld [vmem:[%s4343_s4 + $0x3d] sm:$0xff]  ;;  %v3326_v33 = vld [vmem:[%s4343_s4 + $0x4d] sm:$0xff]  ;;  %v3327_v35 = vld [vmem:[%s4343_s4 + $0x55] sm:$0xff] }
  0x3e   : > { %3598 = vmatmul.mubr.msk.f32.gmra.mrb[14].mxu1 %vm237_vm1, %v3089_v37  ;;  %3728 = vmatmul.mubr.msk.f32.gmra.mrb[4].mxu0 %vm237_vm1, %v4437_v38  ;;  %v3328_v37 = vld [vmem:[%s4343_s4 + $0x5d] sm:$0xff] }
  0x3f   : > { %3600 = vmatprep.mubr.msk.f32.mxu1 %vm237_vm1, %v3090_v39  ;;  %3730 = vmatprep.mubr.msk.f32.mxu0 %vm237_vm1, %v4441_v40  ;;  %v3330_v39 = vld [vmem:[%s4343_s4 + $0x6d] sm:$0xff] }
  0x42   : > { %3601 = vmatmul.mubr.msk.f32.gmra.mrb[16].mxu1 %vm237_vm1, %v3091_v41  ;;  %3731 = vmatmul.mubr.msk.f32.gmra.mrb[6].mxu0 %vm237_vm1, %v4451_v42  ;;  %v3332_v41 = vld [vmem:[%s4343_s4 + $0x7d] sm:$0xff] }
  0x43   : > { %3605 = vmatprep.mubr.msk.f32.mxu1 %vm237_vm1, %v196_v43  ;;  %3733 = vmatprep.mubr.msk.f32.mxu0 %vm237_vm1, %v4455_v44  ;;  %v3334_v43 = vld [vmem:[%s4343_s4 + $0x8d] sm:$0xff] }
  0x46   : > { %3606 = vmatmul.mubr.msk.f32.vlgmr.msra.gmra.mrb[0].mxu1 %vm237_vm1, %v197_v45  ;;  %3734 = vmatmul.mubr.msk.f32.gmra.mrb[8].mxu0 %vm237_vm1, %v4465_v46  ;;  %v3337_v45 = vld [vmem:[%s4343_s4 + $0xa5] sm:$0xff] }
  0x47   : > { %3608 = vmatprep.mubr.msk.f32.mxu1 %vm237_vm1, %v198_v47  ;;  %3736 = vmatprep.mubr.msk.f32.mxu0 %vm237_vm1, %v4469_v48  ;;  %v3359_v47 = vld [vmem:[%s4343_s4 + $0x26] sm:$0xff] }
  0x48   : > { %3633 = vmatpush3.msk.msra.mxu1 %vm292_vm0, %v4361_v11  ;;  %v3132_v11 = vld [vmem:[%s4343_s4 + $0xa] sm:$0xff] }
  0x49   : > { %3661 = vmatprep.subr.msk.mxu1 %vm292_vm0, %v4477_v49 }
  0x4a   : > { %3609 = vmatmul.mubr.msk.f32.gmra.mrb[2].mxu1 %vm237_vm1, %v199_v50  ;;  %3737 = vmatmul.mubr.msk.f32.gmra.mrb[10].mxu0 %vm237_vm1, %v3256_v51  ;;  %v3362_v50 = vld [vmem:[%s4343_s4 + $0x3e] sm:$0xff] }
  0x4b   : > { %3611 = vmatprep.mubr.msk.f32.mxu1 %vm237_vm1, %v200_v52  ;;  %3739 = vmatprep.mubr.msk.f32.mxu0 %vm237_vm1, %v3257_v53  ;;  %v3364_v52 = vld [vmem:[%s4343_s4 + $0x4e] sm:$0xff] }
  0x4e   : > { %3612 = vmatmul.mubr.msk.f32.gmra.mrb[4].mxu1 %vm237_vm1, %v201_v54  ;;  %3740 = vmatmul.mubr.msk.f32.gmra.mrb[12].mxu0 %vm237_vm1, %v3258_v55  ;;  %v3365_v54 = vld [vmem:[%s4343_s4 + $0x56] sm:$0xff] }
  0x4f   : > { %3614 = vmatprep.mubr.msk.f32.mxu1 %vm237_vm1, %v202_v56  ;;  %3742 = vmatprep.mubr.msk.f32.mxu0 %vm237_vm1, %v3259_v57  ;;  %v3366_v56 = vld [vmem:[%s4343_s4 + $0x5e] sm:$0xff] }
  0x52   : > { %3615 = vmatmul.mubr.msk.f32.gmra.mrb[6].mxu1 %vm237_vm1, %v203_v58  ;;  %3743 = vmatmul.mubr.msk.f32.gmra.mrb[14].mxu0 %vm237_vm1, %v3260_v59  ;;  %v3367_v58 = vld [vmem:[%s4343_s4 + $0x66] sm:$0xff] }
  0x53   : > { %3617 = vmatprep.mubr.msk.f32.mxu1 %vm237_vm1, %v204_v60  ;;  %3745 = vmatprep.mubr.msk.f32.mxu0 %vm237_vm1, %v3261_v61  ;;  %v3368_v60 = vld [vmem:[%s4343_s4 + $0x6e] sm:$0xff] }
  0x56   : > { %3618 = vmatmul.mubr.msk.f32.gmra.mrb[8].mxu1 %vm237_vm1, %v205_v62  ;;  %3746 = vmatmul.mubr.msk.f32.gmra.mrb[16].mxu0 %vm237_vm1, %v3262_v63  ;;  %v3369_v62 = vld [vmem:[%s4343_s4 + $0x76] sm:$0xff] }
  0x57   : > { %3620 = vmatprep.mubr.msk.f32.mxu1 %vm237_vm1, %v206_v1  ;;  %3750 = vmatprep.mubr.msk.f32.mxu0 %vm237_vm1, %v4406_v31  ;;  %v3325_v31 = vld [vmem:[%s4343_s4 + $0x45] sm:$0xff] }
  0x58   : > { %v3370_v1 = vld [vmem:[%s4343_s4 + $0x7e] sm:$0xff] }
  0x5a   : > { %3621 = vmatmul.mubr.msk.f32.gmra.mrb[10].mxu1 %vm237_vm1, %v207_v2  ;;  %3751 = vmatmul.mubr.msk.f32.vlgmr.msra.gmra.mrb[0].mxu0 %vm237_vm1, %v4419_v34  ;;  %v3147_v34 = vld [vmem:[%s4343_s4 + $0x82] sm:$0xff] }
  0x5b   : > { %3778 = vmatpush3.msk.msra.mxu0 %vm292_vm0, %v4411_v32  ;;  %3623 = vmatprep.mubr.msk.f32.mxu1 %vm237_vm1, %v208_v3  ;;  %v3146_v32 = vld [vmem:[%s4343_s4 + $0x7a] sm:$0xff]  ;;  %v3221_v2 = vld [vmem:[%s4343_s4 + $0x83] sm:$0xff] }
  0x5c   : > { %3753 = vmatprep.mubr.msk.f32.mxu0 %vm237_vm1, %v4425_v36  ;;  %3806 = vmatprep.subr.msk.mxu0 %vm292_vm0, %v4523_v4  ;;  %v3148_v36 = vld [vmem:[%s4343_s4 + $0x8a] sm:$0xff] }
  0x5d   : > { %v3371_v3 = vld [vmem:[%s4343_s4 + $0x86] sm:$0xff] }
  0x5e   : > { %3624 = vmatmul.mubr.msk.f32.gmra.mrb[12].mxu1 %vm237_vm1, %v209_v5  ;;  %3754 = vmatmul.mubr.msk.f32.gmra.mrb[2].mxu0 %vm237_vm1, %v4437_v38  ;;  %v3329_v38 = vld [vmem:[%s4343_s4 + $0x65] sm:$0xff]  ;;  %v3372_v5 = vld [vmem:[%s4343_s4 + $0x8e] sm:$0xff] }
  0x5f   : > { %3626 = vmatprep.mubr.msk.f32.mxu1 %vm237_vm1, %v210_v6  ;;  %3756 = vmatprep.mubr.msk.f32.mxu0 %vm237_vm1, %v4441_v40  ;;  %v3331_v40 = vld [vmem:[%s4343_s4 + $0x75] sm:$0xff] }
  0x60   : > { %v3223_v6 = vld [vmem:[%s4343_s4 + $0x93] sm:$0xff] }
  0x62   : > { %3627 = vmatmul.mubr.msk.f32.gmra.mrb[14].mxu1 %vm237_vm1, %v211_v7  ;;  %3757 = vmatmul.mubr.msk.f32.gmra.mrb[4].mxu0 %vm237_vm1, %v4451_v42  ;;  %v3333_v42 = vld [vmem:[%s4343_s4 + $0x85] sm:$0xff]  ;;  %v3373_v7 = vld [vmem:[%s4343_s4 + $0x96] sm:$0xff] }
  0x63   : > { %3629 = vmatprep.mubr.msk.f32.mxu1 %vm237_vm1, %v212_v8  ;;  %3759 = vmatprep.mubr.msk.f32.mxu0 %vm237_vm1, %v4455_v44  ;;  %v3335_v44 = vld [vmem:[%s4343_s4 + $0x95] sm:$0xff] }
  0x64   : > { %v3224_v8 = vld [vmem:[%s4343_s4 + $0x9b] sm:$0xff] }
  0x66   : > { %3630 = vmatmul.mubr.msk.f32.gmra.mrb[16].mxu1 %vm237_vm1, %v213_v9  ;;  %3760 = vmatmul.mubr.msk.f32.gmra.mrb[6].mxu0 %vm237_vm1, %v4465_v46  ;;  %v3338_v46 = vld [vmem:[%s4343_s4 + $0xad] sm:$0xff]  ;;  %v3374_v9 = vld [vmem:[%s4343_s4 + $0x9e] sm:$0xff] }
  0x67   : > { %3634 = vmatprep.mubr.msk.f32.mxu1 %vm237_vm1, %v3131_v10  ;;  %3762 = vmatprep.mubr.msk.f32.mxu0 %vm237_vm1, %v4469_v48  ;;  %v3360_v48 = vld [vmem:[%s4343_s4 + $0x2e] sm:$0xff]  ;;  %v3375_v10 = vld [vmem:[%s4343_s4 + $0xa6] sm:$0xff] }
  0x6a   : > { %3635 = vmatmul.mubr.msk.f32.vlgmr.msra.gmra.mrb[0].mxu1 %vm237_vm1, %v3132_v11  ;;  %3763 = vmatmul.mubr.msk.f32.gmra.mrb[8].mxu0 %vm237_vm1, %v3256_v51  ;;  %v3363_v51 = vld [vmem:[%s4343_s4 + $0x46] sm:$0xff]  ;;  %v3376_v11 = vld [vmem:[%s4343_s4 + $0xae] sm:$0xff] }
  0x6b   : > { %3637 = vmatprep.mubr.msk.f32.mxu1 %vm237_vm1, %v4561_v12  ;;  %3765 = vmatprep.mubr.msk.f32.mxu0 %vm237_vm1, %v3257_v53  ;;  %v3185_v53 = vld [vmem:[%s4343_s4 + $0x92] sm:$0xff] }
  0x6c   : > { %3662 = vmatpush3.msk.msra.mxu1 %vm292_vm0, %v4477_v49  ;;  %v3361_v49 = vld [vmem:[%s4343_s4 + $0x36] sm:$0xff] }
  0x6d   : > { %3835 = vmatprep.subr.msk.mxu1 %vm292_vm0, %v4318_v0 }
  0x6e   : > { %3638 = vmatmul.mubr.msk.f32.gmra.mrb[2].mxu1 %vm237_vm1, %v4569_v13  ;;  %3766 = vmatmul.mubr.msk.f32.gmra.mrb[10].mxu0 %vm237_vm1, %v3258_v55  ;;  %v3186_v55 = vld [vmem:[%s4343_s4 + $0x9a] sm:$0xff] }
  0x6f   : > { %3640 = vmatprep.mubr.msk.f32.mxu1 %vm237_vm1, %v4574_v14  ;;  %3768 = vmatprep.mubr.msk.f32.mxu0 %vm237_vm1, %v3259_v57  ;;  %v3217_v57 = vld [vmem:[%s4343_s4 + $0x63] sm:$0xff] }
  0x72   : > { %3641 = vmatmul.mubr.msk.f32.gmra.mrb[4].mxu1 %vm237_vm1, %v3136_v15  ;;  %3769 = vmatmul.mubr.msk.f32.gmra.mrb[12].mxu0 %vm237_vm1, %v3260_v59  ;;  %v3218_v59 = vld [vmem:[%s4343_s4 + $0x6b] sm:$0xff] }
  0x73   : > { %3643 = vmatprep.mubr.msk.f32.mxu1 %vm237_vm1, %v4586_v16  ;;  %3771 = vmatprep.mubr.msk.f32.mxu0 %vm237_vm1, %v3261_v61  ;;  %v3219_v61 = vld [vmem:[%s4343_s4 + $0x73] sm:$0xff] }
  0x76   : > { %3644 = vmatmul.mubr.msk.f32.gmra.mrb[6].mxu1 %vm237_vm1, %v3138_v17  ;;  %3772 = vmatmul.mubr.msk.f32.gmra.mrb[14].mxu0 %vm237_vm1, %v3262_v63  ;;  %v3220_v63 = vld [vmem:[%s4343_s4 + $0x7b] sm:$0xff] }
  0x77   : > { %3646 = vmatprep.mubr.msk.f32.mxu1 %vm237_vm1, %v4595_v18  ;;  %3774 = vmatprep.mubr.msk.f32.mxu0 %vm237_vm1, %v3299_v19 }
  0x7a   : > { %3647 = vmatmul.mubr.msk.f32.gmra.mrb[8].mxu1 %vm237_vm1, %v3140_v20  ;;  %3775 = vmatmul.mubr.msk.f32.gmra.mrb[16].mxu0 %vm237_vm1, %v3300_v21 }
  0x7b   : > { %3649 = vmatprep.mubr.msk.f32.mxu1 %vm237_vm1, %v3141_v22  ;;  %3779 = vmatprep.mubr.msk.f32.mxu0 %vm237_vm1, %v3321_v23 }
  0x7e   : > { %3650 = vmatmul.mubr.msk.f32.gmra.mrb[10].mxu1 %vm237_vm1, %v3142_v24  ;;  %3780 = vmatmul.mubr.msk.f32.vlgmr.msra.gmra.mrb[0].mxu0 %vm237_vm1, %v3322_v25 }
  0x7f   : > { %3807 = vmatpush3.msk.msra.mxu0 %vm292_vm0, %v4523_v4  ;;  %3652 = vmatprep.mubr.msk.f32.mxu1 %vm237_vm1, %v3143_v26  ;;  %v3222_v4 = vld [vmem:[%s4343_s4 + $0x8b] sm:$0xff] }
  0x80   : > { %3782 = vmatprep.mubr.msk.f32.mxu0 %vm237_vm1, %v3323_v27 }
  0x82   : > { %3653 = vmatmul.mubr.msk.f32.gmra.mrb[12].mxu1 %vm237_vm1, %v3144_v28  ;;  %3783 = vmatmul.mubr.msk.f32.gmra.mrb[2].mxu0 %vm237_vm1, %v3324_v29 }
  0x83   : > { %3655 = vmatprep.mubr.msk.f32.mxu1 %vm237_vm1, %v3145_v30  ;;  %3785 = vmatprep.mubr.msk.f32.mxu0 %vm237_vm1, %v3325_v31 }
  0x86   : > { %3656 = vmatmul.mubr.msk.f32.gmra.mrb[14].mxu1 %vm237_vm1, %v3146_v32  ;;  %3786 = vmatmul.mubr.msk.f32.gmra.mrb[4].mxu0 %vm237_vm1, %v3326_v33 }
  0x87   : > { %3658 = vmatprep.mubr.msk.f32.mxu1 %vm237_vm1, %v3147_v34  ;;  %3788 = vmatprep.mubr.msk.f32.mxu0 %vm237_vm1, %v3327_v35 }
  0x8a   : > { %3659 = vmatmul.mubr.msk.f32.gmra.mrb[16].mxu1 %vm237_vm1, %v3148_v36  ;;  %3789 = vmatmul.mubr.msk.f32.gmra.mrb[6].mxu0 %vm237_vm1, %v3328_v37 }
  0x8b   : > { %3663 = vmatprep.mubr.msk.f32.mxu1 %vm237_vm1, %v4561_v12  ;;  %3791 = vmatprep.mubr.msk.f32.mxu0 %vm237_vm1, %v3329_v38  ;;  %v2427_v12 = vlaneseq }
  0x8e   : > { %3664 = vmatmul.mubr.msk.f32.vlgmr.msra.gmra.mrb[0].mxu1 %vm237_vm1, %v4569_v13  ;;  %3792 = vmatmul.mubr.msk.f32.gmra.mrb[8].mxu0 %vm237_vm1, %v3330_v39  ;;  %v4740_v13 = vshrl.u32 %v2427_v12, 7 }
  0x8f   : > { %3666 = vmatprep.mubr.msk.f32.mxu1 %vm237_vm1, %v4574_v14  ;;  %3794 = vmatprep.mubr.msk.f32.mxu0 %vm237_vm1, %v3331_v40 }
  0x90   : > { %3836 = vmatpush3.msk.msra.mxu1 %vm292_vm0, %v4318_v0  ;;  %v3336_v0 = vld [vmem:[%s4343_s4 + $0x9d] sm:$0xff]  ;;  %v2429_v14 = vadd.s32 8, %v4740_v13  ;;  %v4770_v35 = vadd.s32 56, %v4740_v13  ;;  %v4777_v38 = vadd.s32 48, %v4740_v13  ;;  %s3398_s4 = sshll.u32 %s2925_s29, 4  ;;  %s4098_s29 = sshll.u32 %s4222_s27, 4  ;;  %s4099_s29 = int_to_ptr.vmem [resolvable:$false] %s4098_s29 }
  0x91   : > { %s5422_s10 = scalar_lea.hbm %s5511_s2, %s3398_s4  ;;  %s5429_s20 = scalar_lea.hbm %s5512_s3, %s3398_s4 }
  0x92   : > { %3667 = vmatmul.mubr.msk.f32.gmra.mrb[2].mxu1 %vm237_vm1, %v3136_v15  ;;  %3795 = vmatmul.mubr.msk.f32.gmra.mrb[10].mxu0 %vm237_vm1, %v3332_v41  ;;  %v4782_v41 = vadd.s32 72, %v4740_v13  ;;  %s4100_s8 = scalar_lea.vmem %s4099_s29, 32  ;;  %p4101_p2 = scmp.lt.s32.totalorder %s5424_s6, %s4099_s29 }
  0x93   : > { %3669 = vmatprep.mubr.msk.f32.mxu1 %vm237_vm1, %v4586_v16  ;;  %3797 = vmatprep.mubr.msk.f32.mxu0 %vm237_vm1, %v3333_v42  ;;  %v4743_v15 = vmul.u32.u64.low 3817748708, %v2429_v14  ;;  %v4744_v16 = vmul.u32.u64.high 3817748708, %v2429_v14, %v4743_v15  ;;  %p4102_p4 = scmp.lt.s32.totalorder %s4100_s8, %s4094_s24 }
  0x95   : > { %v2463_v25 = vshrl.u32 %v4744_v16, 4  ;;  %p4103_p5 = por %p4102_p4, %p4101_p2 }
  0x96   : > { %3670 = vmatmul.mubr.msk.f32.gmra.mrb[4].mxu1 %vm237_vm1, %v3138_v17  ;;  %3798 = vmatmul.mubr.msk.f32.gmra.mrb[12].mxu0 %vm237_vm1, %v3334_v43  ;;  %v2431_v17 = vadd.s32 24, %v4740_v13 }
  0x97   : > { %3672 = vmatprep.mubr.msk.f32.mxu1 %vm237_vm1, %v4595_v18  ;;  %3800 = vmatprep.mubr.msk.f32.mxu0 %vm237_vm1, %v3335_v44  ;;  %v4748_v18 = vmul.u32.u64.low 3817748708, %v4740_v13  ;;  %v4749_v19 = vmul.u32.u64.high 3817748708, %v4740_v13, %v4748_v18  ;;  %v2464_v29 = vmul.u32 18, %v2463_v25  ;;  %p4104_p6 = pnand %p4103_p5, %p4097_p1 }
  0x99   : > { %v2452_v27 = vshrl.u32 %v4749_v19, 4  ;;  %v4779_v39 = vsub.s32 %v2429_v14, %v2464_v29 }
  0x9a   : > { %3673 = vmatmul.mubr.msk.f32.gmra.mrb[6].mxu1 %vm237_vm1, %v3140_v20  ;;  %3801 = vmatmul.mubr.msk.f32.gmra.mrb[14].mxu0 %vm237_vm1, %v3336_v0  ;;  %v2430_v20 = vadd.s32 16, %v4740_v13  ;;  %v4788_v44 = vmul.u32.u64.low 3817748708, %v4770_v35  ;;  %v4789_v0 = vmul.u32.u64.high 3817748708, %v4770_v35, %v4788_v44 }
  0x9b   : > { %3675 = vmatprep.mubr.msk.f32.mxu1 %vm237_vm1, %v3141_v22  ;;  %3803 = vmatprep.mubr.msk.f32.mxu0 %vm237_vm1, %v3337_v45  ;;  %v4752_v21 = vmul.u32.u64.low 3817748708, %v2431_v17  ;;  %v4753_v22 = vmul.u32.u64.high 3817748708, %v2431_v17, %v4752_v21  ;;  %v2453_v33 = vmul.u32 18, %v2452_v27  ;;  %vm2645_vm2 = vcmp.ne.s32.totalorder %v4779_v39, 0 }
  0x9c   : > { %vm2663_vm3 = vcmp.lt.s32.totalorder %v4779_v39, 0 }
  0x9d   : > { %v4785_v42 = vsub.s32 %v4740_v13, %v2453_v33  ;;  %vm4850_vm9 = vmand %vm2663_vm3, %vm2645_vm2 }
  0x9e   : > { %3676 = vmatmul.mubr.msk.f32.gmra.mrb[8].mxu1 %vm237_vm1, %v3142_v24  ;;  %3804 = vmatmul.mubr.msk.f32.gmra.mrb[16].mxu0 %vm237_vm1, %v3338_v46  ;;  %v4755_v23 = vmul.u32.u64.low 3817748708, %v2430_v20  ;;  %v4756_v24 = vmul.u32.u64.high 3817748708, %v2430_v20, %v4755_v23  ;;  %v4792_v45 = vmul.u32.u64.low 3817748708, %v4777_v38  ;;  %v4793_v46 = vmul.u32.u64.high 3817748708, %v4777_v38, %v4792_v45 }
  0x9f   : > { %3678 = vmatprep.mubr.msk.f32.mxu1 %vm237_vm1, %v3143_v26  ;;  %3808 = vmatprep.mubr.msk.f32.mxu0 %vm237_vm1, %v3359_v47  ;;  %v2433_v26 = vadd.s32 40, %v4740_v13  ;;  %v4796_v47 = vadd.s32 64, %v4740_v13  ;;  %vm2644_vm4 = vcmp.ne.s32.totalorder %v4785_v42, 0  ;;  %vm2662_vm5 = vcmp.lt.s32.totalorder %v4785_v42, 0 }
  0xa0   : > { %vm4862_vm11 = vmand %vm2662_vm5, %vm2644_vm4 }
  0xa2   : > { %3679 = vmatmul.mubr.msk.f32.gmra.mrb[10].mxu1 %vm237_vm1, %v3144_v28  ;;  %3809 = vmatmul.mubr.msk.f32.vlgmr.msra.gmra.mrb[0].mxu0 %vm237_vm1, %v3360_v48  ;;  %v4762_v28 = vadd.s32 32, %v4740_v13 }
  0xa3   : > { %3681 = vmatprep.mubr.msk.f32.mxu1 %vm237_vm1, %v3145_v30  ;;  %3811 = vmatprep.mubr.msk.f32.mxu0 %vm237_vm1, %v3361_v49  ;;  %v2485_v30 = vshrl.u32 %v4753_v22, 4  ;;  %v4802_v49 = vadd.s32 88, %v4740_v13 }
  0xa5   : > { %v2486_v40 = vmul.u32 18, %v2485_v30 }
  0xa6   : > { %3682 = vmatmul.mubr.msk.f32.gmra.mrb[12].mxu1 %vm237_vm1, %v3146_v32  ;;  %3812 = vmatmul.mubr.msk.f32.gmra.mrb[2].mxu0 %vm237_vm1, %v3362_v50  ;;  %v4765_v31 = vmul.u32.u64.low 3817748708, %v2433_v26  ;;  %v4766_v32 = vmul.u32.u64.high 3817748708, %v2433_v26, %v4765_v31 }
  0xa7   : > { %3684 = vmatprep.mubr.msk.f32.mxu1 %vm237_vm1, %v3147_v34  ;;  %3814 = vmatprep.mubr.msk.f32.mxu0 %vm237_vm1, %v3363_v51  ;;  %v2474_v34 = vshrl.u32 %v4756_v24, 4  ;;  %v4799_v48 = vsub.s32 %v2431_v17, %v2486_v40 }
  0xa8   : > { %v2507_v50 = vshrl.u32 %v4766_v32, 4 }
  0xa9   : > { %v2475_v43 = vmul.u32 18, %v2474_v34  ;;  %vm2647_vm6 = vcmp.ne.s32.totalorder %v4799_v48, 0  ;;  %vm2665_vm7 = vcmp.lt.s32.totalorder %v4799_v48, 0  ;;  %v4870_v12 = vadd.s32 18, %v4799_v48 }
  0xaa   : > { %3685 = vmatmul.mubr.msk.f32.gmra.mrb[14].mxu1 %vm237_vm1, %v3148_v36  ;;  %3815 = vmatmul.mubr.msk.f32.gmra.mrb[4].mxu0 %vm237_vm1, %v3364_v52  ;;  %v4773_v36 = vmul.u32.u64.low 3817748708, %v4762_v28  ;;  %v4774_v37 = vmul.u32.u64.high 3817748708, %v4762_v28, %v4773_v36  ;;  %v4806_v51 = vmul.u32.u64.low 3817748708, %v4782_v41  ;;  %v4807_v52 = vmul.u32.u64.high 3817748708, %v4782_v41, %v4806_v51  ;;  %vm4881_vm12 = vmand %vm2665_vm7, %vm2647_vm6 }
  0xab   : > { %3687 = vmatprep.mubr.msk.f32.mxu1 %vm237_vm1, %v3185_v53  ;;  %3817 = vmatprep.mubr.msk.f32.mxu0 %vm237_vm1, %v3365_v54  ;;  %v4810_v53 = vadd.s32 80, %v4740_v13  ;;  %v4814_v54 = vsub.s32 %v2430_v20, %v2475_v43  ;;  %v2719_v32 = vsel %vm4881_vm12, %v4870_v12, %v4799_v48  ;;  %v4938_v43 = vadd.s32 112, %v4740_v13 }
  0xac   : > { %v2551_v18 = vshrl.u32 %v4807_v52, 4  ;;  %v4952_v51 = vadd.s32 136, %v4740_v13 }
  0xad   : > { %vm2646_vm8 = vcmp.ne.s32.totalorder %v4814_v54, 0  ;;  %vm2664_vm10 = vcmp.lt.s32.totalorder %v4814_v54, 0  ;;  %v4873_v14 = vadd.s32 18, %v4814_v54 }
  0xae   : > { %3688 = vmatmul.mubr.msk.f32.gmra.mrb[16].mxu1 %vm237_vm1, %v3186_v55  ;;  %3818 = vmatmul.mubr.msk.f32.gmra.mrb[6].mxu0 %vm237_vm1, %v3366_v56  ;;  %v4817_v55 = vadd.s32 104, %v4740_v13  ;;  %v2496_v56 = vshrl.u32 %v4774_v37, 4  ;;  %vm4898_vm13 = vmand %vm2664_vm10, %vm2646_vm8  ;;  %v2552_v36 = vmul.u32 18, %v2551_v18 }
  0xaf   : > { %3707 = vmatprep.mubr.msk.f32.mxu1 %vm237_vm1, %v3217_v57  ;;  %3820 = vmatprep.mubr.msk.f32.mxu0 %vm237_vm1, %v3367_v58  ;;  %v4822_v57 = vmul.u32.u64.low 3817748708, %v4796_v47  ;;  %v4823_v58 = vmul.u32.u64.high 3817748708, %v4796_v47, %v4822_v57  ;;  %v2718_v34 = vsel %vm4898_vm13, %v4873_v14, %v4814_v54 }
  0xb0   : > { %vm5089_vm12 = vcmp.lt.s32.totalorder %v2718_v34, 16 }
  0xb1   : > { %v2540_v29 = vshrl.u32 %v4823_v58, 4 }
  0xb2   : > { %3708 = vmatmul.mubr.msk.f32.vlgmr.msra.gmra.mrb[10].mxu1 %vm237_vm1, %v3218_v59  ;;  %3821 = vmatmul.mubr.msk.f32.gmra.mrb[8].mxu0 %vm237_vm1, %v3368_v60  ;;  %v4828_v59 = vmul.u32.u64.low 3817748708, %v4802_v49  ;;  %v4829_v60 = vmul.u32.u64.high 3817748708, %v4802_v49, %v4828_v59 }
  0xb3   : > { %3710 = vmatprep.mubr.msk.f32.mxu1 %vm237_vm1, %v3219_v61  ;;  %3823 = vmatprep.mubr.msk.f32.mxu0 %vm237_vm1, %v3369_v62  ;;  %v2508_v61 = vmul.u32 18, %v2507_v50  ;;  %v2541_v45 = vmul.u32 18, %v2540_v29 }
  0xb5   : > { %v4885_v17 = vsub.s32 %v2433_v26, %v2508_v61 }
  0xb6   : > { %3711 = vmatmul.mubr.msk.f32.gmra.mrb[12].mxu1 %vm237_vm1, %v3220_v63  ;;  %3824 = vmatmul.mubr.msk.f32.gmra.mrb[10].mxu0 %vm237_vm1, %v3370_v1  ;;  %v4832_v62 = vmul.u32.u64.low 3817748708, %v4810_v53  ;;  %v4833_v63 = vmul.u32.u64.high 3817748708, %v4810_v53, %v4832_v62  ;;  %v4836_v1 = vadd.s32 96, %v4740_v13 }
  0xb7   : > { %3713 = vmatprep.mubr.msk.f32.mxu1 %vm237_vm1, %v3221_v2  ;;  %3826 = vmatprep.mubr.msk.f32.mxu0 %vm237_vm1, %v3371_v3  ;;  %v4840_v2 = vmul.u32.u64.low 3817748708, %v4817_v55  ;;  %v4841_v3 = vmul.u32.u64.high 3817748708, %v4817_v55, %v4840_v2  ;;  %vm2649_vm14 = vcmp.ne.s32.totalorder %v4885_v17, 0  ;;  %vm2667_vm15 = vcmp.lt.s32.totalorder %v4885_v17, 0 }
  0xb8   : > { %v4889_v19 = vmul.u32.u64.low 3817748708, %v4836_v1  ;;  %v4890_v20 = vmul.u32.u64.high 3817748708, %v4836_v1, %v4889_v19  ;;  %v2562_v37 = vshrl.u32 %v4833_v63, 4  ;;  %v4934_v40 = vadd.s32 18, %v4885_v17  ;;  %vm4980_vm5 = vmand %vm2667_vm15, %vm2649_vm14 }
  0xb9   : > { %v4967_v61 = vmul.u32.u64.low 3817748708, %v4938_v43  ;;  %v4968_v62 = vmul.u32.u64.high 3817748708, %v4938_v43, %v4967_v61 }
  0xba   : > { %3714 = vmatmul.mubr.msk.f32.gmra.mrb[14].mxu1 %vm237_vm1, %v3222_v4  ;;  %3827 = vmatmul.mubr.msk.f32.gmra.mrb[12].mxu0 %vm237_vm1, %v3372_v5  ;;  %v4844_v4 = vadd.s32 120, %v4740_v13  ;;  %v2584_v57 = vshrl.u32 %v4890_v20, 4  ;;  %v2721_v19 = vsel %vm4980_vm5, %v4934_v40, %v4885_v17 }
  0xbb   : > { %3716 = vmatprep.mubr.msk.f32.mxu1 %vm237_vm1, %v3223_v6  ;;  %3829 = vmatprep.mubr.msk.f32.mxu0 %vm237_vm1, %v3373_v7  ;;  %v2497_v6 = vmul.u32 18, %v2496_v56  ;;  %v2529_v7 = vshrl.u32 %v4789_v0, 4  ;;  %v4957_v56 = vsub.s32 %v4782_v41, %v2552_v36  ;;  %v4974_v41 = vsub.s32 %v4796_v47, %v2541_v45 }
  0xbc   : > { %v4903_v23 = vmul.u32.u64.low 3817748708, %v4844_v4  ;;  %v4904_v24 = vmul.u32.u64.high 3817748708, %v4844_v4, %v4903_v23  ;;  %v2606_v54 = vshrl.u32 %v4968_v62, 4 }
  0xbd   : > { %v4907_v25 = vsub.s32 %v4762_v28, %v2497_v6  ;;  %v2530_v26 = vmul.u32 18, %v2529_v7  ;;  %v2573_v28 = vshrl.u32 %v4829_v60, 4  ;;  %v2585_v7 = vmul.u32 18, %v2584_v57 }
  0xbe   : > { %3717 = vmatmul.mubr.msk.f32.gmra.mrb[16].mxu1 %vm237_vm1, %v3224_v8  ;;  %3830 = vmatmul.mubr.msk.f32.gmra.mrb[14].mxu0 %vm237_vm1, %v3374_v9  ;;  %v2518_v8 = vshrl.u32 %v4793_v46, 4  ;;  %v2699_v9 = vadd.s32 18, %v4779_v39  ;;  %v2617_v60 = vshrl.u32 %v4904_v24, 4  ;;  %vm2671_vm14 = vcmp.lt.s32.totalorder %v4957_v56, 0 }
  0xbf   : > { %3832 = vmatprep.mubr.msk.f32.mxu0 %vm237_vm1, %v3375_v10  ;;  %vm2648_vm0 = vcmp.ne.s32.totalorder %v4907_v25, 0  ;;  %v4942_v44 = vsub.s32 %v4770_v35, %v2530_v26  ;;  %v4949_v46 = vadd.s32 18, %v4907_v25  ;;  %v2574_v50 = vmul.u32 18, %v2573_v28 }
  0xc0   : > { %v2519_v27 = vmul.u32 18, %v2518_v8  ;;  %v2717_v30 = vsel %vm4850_vm9, %v2699_v9, %v4779_v39  ;;  %v2563_v35 = vmul.u32 18, %v2562_v37  ;;  %v5051_v24 = vadd.s32 18, %v4957_v56 }
  0xc1   : > { %vm2651_vm2 = vcmp.ne.s32.totalorder %v4942_v44, 0  ;;  %vm2669_vm3 = vcmp.lt.s32.totalorder %v4942_v44, 0  ;;  %v4986_v63 = vsub.s32 %v4802_v49, %v2574_v50  ;;  %vm4994_vm7 = vcmp.lt.s32.totalorder %v2717_v30, 16 }
  0xc2   : > { %3833 = vmatmul.mubr.msk.f32.gmra.mrb[16].mxu0 %vm237_vm1, %v3376_v11  ;;  %v4867_v11 = vadd.s32 18, %v4785_v42  ;;  %v4945_v0 = vsub.s32 %v4777_v38, %v2519_v27  ;;  %vm2666_vm1 = vcmp.lt.s32.totalorder %v4907_v25, 0  ;;  %v4961_v38 = vadd.s32 128, %v4740_v13  ;;  %vm5032_vm15 = vmand %vm2669_vm3, %vm2651_vm2 }
  0xc3   : > { %v4999_v6 = vsub.s32 %v4810_v53, %v2563_v35  ;;  %vm5015_vm10 = vmand %vm2666_vm1, %vm2648_vm0  ;;  %v2618_v18 = vmul.u32 18, %v2617_v60  ;;  %v2705_v23 = vadd.s32 18, %v4942_v44  ;;  %vm2652_vm0 = vcmp.ne.s32.totalorder %v4974_v41, 0 }
  0xc4   : > { %v2716_v31 = vsel %vm4862_vm11, %v4867_v11, %v4785_v42  ;;  %v2595_v42 = vshrl.u32 %v4841_v3, 4  ;;  %vm2650_vm4 = vcmp.ne.s32.totalorder %v4945_v0, 0  ;;  %vm2668_vm6 = vcmp.lt.s32.totalorder %v4945_v0, 0 }
  0xc5   : > { %v4989_v2 = vmul.u32.u64.low 3817748708, %v4952_v51  ;;  %v4990_v3 = vmul.u32.u64.high 3817748708, %v4952_v51, %v4989_v2  ;;  %v5002_v8 = vmul.u32.u64.low 3817748708, %v4961_v38  ;;  %v5003_v9 = vmul.u32.u64.high 3817748708, %v4961_v38, %v5002_v8  ;;  %vm5043_vm8 = vmand %vm2668_vm6, %vm2650_vm4 }
  0xc6   : > { %v2596_v59 = vmul.u32 18, %v2595_v42  ;;  %vm5007_vm9 = vcmp.lt.s32.totalorder %v2716_v31, 16  ;;  %vm2653_vm11 = vcmp.ne.s32.totalorder %v4957_v56, 0  ;;  %vm2670_vm1 = vcmp.lt.s32.totalorder %v4974_v41, 0 }
  0xc7   : > { %v5048_v17 = vadd.s32 18, %v4945_v0  ;;  %vm2655_vm2 = vcmp.ne.s32.totalorder %v4986_v63, 0  ;;  %vm5062_vm4 = vcmp.lt.s32.totalorder %v2719_v32, 16  ;;  %vm5070_vm5 = vmand %vm2671_vm14, %vm2653_vm11  ;;  %v5075_v30 = vadd.s32 18, %v4974_v41 }
  0xc8   : > { %v5022_v53 = vsub.s32 %v4817_v55, %v2596_v59  ;;  %vm2654_vm6 = vcmp.ne.s32.totalorder %v4999_v6, 0  ;;  %v5080_v48 = vsub.s32 %v4836_v1, %v2585_v7  ;;  %vm5097_vm11 = vmand %vm2670_vm1, %vm2652_vm0  ;;  %v5104_v1 = vsub.s32 %v4844_v4, %v2618_v18 }
  0xc9   : > { %v2720_v14 = vsel %vm5015_vm10, %v4949_v46, %v4907_v25  ;;  %v2723_v22 = vsel %vm5032_vm15, %v2705_v23, %v4942_v44  ;;  %vm5543_vm13 = vcmp.lt.s32.totalorder %v4986_v63, 0  ;;  %v5123_v4 = vadd.s32 18, %v4986_v63 }
  0xca   : > { %vm2657_vm14 = vcmp.ne.s32.totalorder %v5022_v53, 0  ;;  %vm2675_vm3 = vcmp.lt.s32.totalorder %v5022_v53, 0  ;;  %vm5118_vm0 = vmand %vm5543_vm13, %vm2655_vm2  ;;  %v5126_v28 = vadd.s32 18, %v4999_v6  ;;  %v2722_v25 = vsel %vm5043_vm8, %v5048_v17, %v4945_v0 }
  0xcb   : > { %v2725_v34 = vsel %vm5070_vm5, %v5051_v24, %v4957_v56  ;;  %vm5546_vm10 = vcmp.lt.s32.totalorder %v4999_v6, 0  ;;  %v5145_v37 = vadd.s32 18, %v5022_v53  ;;  %v2639_v40 = vshrl.u32 %v4990_v3, 4  ;;  %vm5160_vm1 = vmand %vm2675_vm3, %vm2657_vm14 }
  0xcc   : > { %vm5140_vm15 = vmand %vm5546_vm10, %vm2654_vm6  ;;  %vm5148_vm8 = vcmp.lt.s32.totalorder %v2721_v19, 16  ;;  %v2724_v0 = vsel %vm5097_vm11, %v5075_v30, %v4974_v41  ;;  %vm2656_vm2 = vcmp.ne.s32.totalorder %v5080_v48, 0  ;;  %vm2674_vm5 = vcmp.lt.s32.totalorder %v5080_v48, 0 }
  0xcd   : > { %v2628_v46 = vshrl.u32 %v5003_v9, 4  ;;  %vm5168_vm6 = vcmp.lt.s32.totalorder %v2720_v14, 16  ;;  %vm2659_vm11 = vcmp.ne.s32.totalorder %v5104_v1, 0  ;;  %vm2677_vm3 = vcmp.lt.s32.totalorder %v5104_v1, 0  ;;  %vm5194_vm14 = vmand %vm2674_vm5, %vm2656_vm2 }
  0xce   : > { %v2607_v57 = vmul.u32 18, %v2606_v54  ;;  %v2727_v60 = vsel %vm5118_vm0, %v5123_v4, %v4986_v63  ;;  %v5184_v61 = vadd.s32 18, %v5080_v48  ;;  %v5199_v13 = vadd.s32 18, %v5104_v1  ;;  %vm5212_vm0 = vmand %vm2677_vm3, %vm2659_vm11 }
  0xcf   : > { %v2640_v63 = vmul.u32 18, %v2639_v40  ;;  %vm5557_vm13 = vcmask 261120   ;;  %v2629_v9 = vmul.u32 18, %v2628_v46  ;;  %vm5243_vm5 = vcmp.lt.s32.totalorder %v2725_v34, 16 }
  0xd0   : > { %vm5562_vm10 = vmmov %vm5557_vm13  ;;  %v5223_v23 = vsub.s32 %v4938_v43, %v2607_v57  ;;  %v2728_v29 = vsel %vm5194_vm14, %v5184_v61, %v5080_v48  ;;  %v2731_v43 = vsel %vm5212_vm0, %v5199_v13, %v5104_v1  ;;  %vm5252_vm11 = vcmp.lt.s32.totalorder %v2724_v0, 16 }
  0xd1   : > { %vm5566_vm2 = vmmov %vm5562_vm10  ;;  %v5239_v31 = vsub.s32 %v4952_v51, %v2640_v63  ;;  %v5248_v27 = vsub.s32 %v4961_v38, %v2629_v9 }
  0xd2   : > { %vm2676_vm3 = vcmp.lt.s32.totalorder %v5223_v23, 0  ;;  %v5260_v38 = vadd.s32 18, %v5223_v23  ;;  %vm5572_vm14 = vmmov %vm5566_vm2 }
  0xd3   : > { %vm5596_vm0 = vcmp.lt.s32.totalorder %v5239_v31, 0  ;;  %v2714_v13 = vadd.s32 18, %v5248_v27 }
 0x161   : > { %v4875_v15 = vpop.f32.mrb[0].mxu1 }
 0x162   : > { %v4892_v21 = vpop.f32.mrb[1].mxu1 }
 0x165   : > { %v4922_v33 = vpop.f32.mrb[2].mxu1 }
 0x166   : > { %v4930_v39 = vpop.f32.mrb[3].mxu1 }
 0x169   : > { %v4954_v52 = vpop.f32.mrb[4].mxu1 }
 0x16a   : > { %v4963_v58 = vpop.f32.mrb[5].mxu1 }
 0x16d   : > { %v4992_v5 = vpop.f32.mrb[6].mxu1 }
 0x16e   : > { %v5005_v49 = vpop.f32.mrb[7].mxu1 }
 0x171   : > { %v5055_v26 = vpop.f32.mrb[8].mxu1 }
 0x172   : > { %v5082_v12 = vpop.f32.mrb[9].mxu1 }
 0x175   : > { %v3810_v42 = vpop.f32.mrb[0].mxu0 }
 0x176   : > { %v3837_v50 = vadd.f32 %v3810_v42, %v4875_v15  ;;  %v2320_v56 = vpop.f32.mrb[1].mxu0  ;;  %v2726_v15 = vsel %vm5140_vm15, %v5126_v28, %v4999_v6  ;;  %vm5565_vm15 = vmmov %vm5562_vm10 }
 0x177   : > { %v3838_v59 = vadd.f32 %v2320_v56, %v4892_v21  ;;  %v2729_v21 = vsel %vm5160_vm1, %v5145_v37, %v5022_v53  ;;  %vm2678_vm1 = vcmp.lt.s32.totalorder %v5248_v27, 0 }
 0x178   : > { %v2789_v62 = vsel %vm4994_vm7, %v3837_v50, 0.0  ;;  %vm5204_vm7 = vcmp.lt.s32.totalorder %v2723_v22, 16 }
 0x179   : > { %v2808_v2 = vsel %vm5557_vm13, %v2789_v62, 0.0  ;;  %v2851_v3 = vmul.f32 %v2789_v62, %v2789_v62  ;;  %v2788_v47 = vsel %vm5007_vm9, %v3838_v59, 0.0  ;;  %v3813_v6 = vpop.f32.mrb[2].mxu0  ;;  %vm5218_vm9 = vcmp.lt.s32.totalorder %v2722_v25, 16  ;;  %vm5573_vm13 = vmmov %vm5566_vm2 }
 0x17a   : > { %v2807_v11 = vsel %vm5562_vm10, %v2788_v47, 0.0  ;;  %v2850_v18 = vmul.f32 %v2788_v47, %v2788_v47  ;;  %v3839_v10 = vadd.f32 %v3813_v6, %v4922_v33  ;;  %v2330_v19 = vpop.f32.mrb[3].mxu0  ;;  %vm2661_vm10 = vcmp.ne.s32.totalorder %v5239_v31, 0 }
 0x17b   : > { %v2869_v55 = vsel %vm5565_vm15, %v2851_v3, 0.0  ;;  %v2809_v17 = vadd.f32 %v2808_v2, %v2807_v11  ;;  %v3840_v24 = vadd.f32 %v2330_v19, %v4930_v39  ;;  %v5283_v2 = vadd.s32 18, %v5239_v31  ;;  %vm5582_vm15 = vmmov %vm5566_vm2 }
 0x17c   : > { %v2868_v33 = vsel %vm5566_vm2, %v2850_v18, 0.0  ;;  %v2791_v30 = vsel %vm5062_vm4, %v3839_v10, 0.0  ;;  %vm5569_vm4 = vmmov %vm5566_vm2 }
 0x17d   : > { %v2870_v54 = vadd.f32 %v2869_v55, %v2868_v33  ;;  %v2853_v39 = vmul.f32 %v2791_v30, %v2791_v30  ;;  %v2790_v14 = vsel %vm5089_vm12, %v3840_v24, 0.0  ;;  %v3816_v22 = vpop.f32.mrb[4].mxu0  ;;  %vm2658_vm12 = vcmp.ne.s32.totalorder %v5223_v23, 0 }
 0x17e   : > { %v2810_v32 = vsel %vm5569_vm4, %v2790_v14, 0.0  ;;  %v2852_v4 = vmul.f32 %v2790_v14, %v2790_v14  ;;  %v3841_v28 = vadd.f32 %v3816_v22, %v4954_v52  ;;  %v2340_v51 = vpop.f32.mrb[5].mxu0  ;;  %v2812_v36 = vsel %vm5572_vm14, %v2791_v30, 0.0  ;;  %vm5576_vm14 = vmmov %vm5566_vm2 }
 0x17f   : > { %v2811_v16 = vadd.f32 %v2810_v32, %v2809_v17  ;;  %v3842_v34 = vadd.f32 %v2340_v51, %v4963_v58  ;;  %v2873_v42 = vsel %vm5566_vm2, %v2853_v39, 0.0  ;;  %vm5271_vm4 = vcmp.lt.s32.totalorder %v2727_v60, 16 }
 0x180   : > { %v2871_v40 = vsel %vm5573_vm13, %v2852_v4, 0.0  ;;  %v2793_v52 = vsel %vm5148_vm8, %v3841_v28, 0.0  ;;  %vm5277_vm8 = vcmp.lt.s32.totalorder %v2726_v15, 16  ;;  %vm5579_vm13 = vmmov %vm5566_vm2 }
 0x181   : > { %v2872_v0 = vadd.f32 %v2871_v40, %v2870_v54  ;;  %v2855_v58 = vmul.f32 %v2793_v52, %v2793_v52  ;;  %v2792_v46 = vsel %vm5168_vm6, %v3842_v34, 0.0  ;;  %v3819_v50 = vpop.f32.mrb[6].mxu0  ;;  %v2813_v57 = vadd.f32 %v2812_v36, %v2811_v16 }
 0x182   : > { %v2814_v44 = vsel %vm5576_vm14, %v2792_v46, 0.0  ;;  %v2854_v59 = vmul.f32 %v2792_v46, %v2792_v46  ;;  %v3843_v61 = vadd.f32 %v3819_v50, %v4992_v5  ;;  %v2350_v62 = vpop.f32.mrb[7].mxu0  ;;  %vm2660_vm6 = vcmp.ne.s32.totalorder %v5248_v27, 0  ;;  %vm5294_vm14 = vmand %vm2676_vm3, %vm2658_vm12 }
 0x183   : > { %v2874_v63 = vadd.f32 %v2873_v42, %v2872_v0  ;;  %v3844_v35 = vadd.f32 %v2350_v62, %v5005_v49  ;;  %v2816_v60 = vsel %vm5579_vm13, %v2793_v52, 0.0  ;;  %v2815_v3 = vadd.f32 %v2814_v44, %v2813_v57  ;;  %vm5585_vm12 = vmmov %vm5566_vm2 }
 0x184   : > { %v2875_v47 = vsel %vm5566_vm2, %v2854_v59, 0.0  ;;  %v2795_v5 = vsel %vm5204_vm7, %v3843_v61, 0.0  ;;  %v2877_v49 = vsel %vm5582_vm15, %v2855_v58, 0.0  ;;  %vm5306_vm7 = vcmp.lt.s32.totalorder %v2729_v21, 16  ;;  %vm5588_vm3 = vmmov %vm5566_vm2 }
 0x185   : > { %v2876_v6 = vadd.f32 %v2875_v47, %v2874_v63  ;;  %v2857_v9 = vmul.f32 %v2795_v5, %v2795_v5  ;;  %v2794_v11 = vsel %vm5218_vm9, %v3844_v35, 0.0  ;;  %v3709_v18 = vpop.f32.mrb[10].mxu1  ;;  %v3822_v10 = vpop.f32.mrb[8].mxu0  ;;  %v2817_v19 = vadd.f32 %v2816_v60, %v2815_v3  ;;  %vm5589_vm15 = vmmov %vm5566_vm2 }
 0x186   : > { %v2818_v55 = vsel %vm5585_vm12, %v2794_v11, 0.0  ;;  %v2856_v17 = vmul.f32 %v2794_v11, %v2794_v11  ;;  %v3845_v24 = vadd.f32 %v3822_v10, %v5055_v26  ;;  %v1362_v33 = vpop.f32.mrb[11].mxu1  ;;  %v2360_v20 = vpop.f32.mrb[9].mxu0  ;;  %vm5312_vm9 = vcmp.lt.s32.totalorder %v2728_v29, 16  ;;  %vm5590_vm13 = vmmov %vm5566_vm2 }
 0x187   : > { %v2878_v45 = vadd.f32 %v2877_v49, %v2876_v6  ;;  %v3846_v54 = vadd.f32 %v2360_v20, %v5082_v12  ;;  %v2730_v53 = vsel %vm5294_vm14, %v5260_v38, %v5223_v23  ;;  %v2820_v37 = vsel %vm5588_vm3, %v2795_v5, 0.0  ;;  %vm5347_vm14 = vmand %vm5596_vm0, %vm2661_vm10 }
 0x188   : > { %v2819_v21 = vadd.f32 %v2818_v55, %v2817_v19  ;;  %v2879_v26 = vsel %vm5589_vm15, %v2856_v17, 0.0  ;;  %v2797_v29 = vsel %vm5243_vm5, %v3845_v24, 0.0  ;;  %v2881_v39 = vsel %vm5590_vm13, %v2857_v9, 0.0  ;;  %vm5593_vm5 = vmmov %vm5588_vm3 }
 0x189   : > { %v2880_v14 = vadd.f32 %v2879_v26, %v2878_v45  ;;  %v2859_v22 = vmul.f32 %v2797_v29, %v2797_v29  ;;  %v2796_v12 = vsel %vm5252_vm11, %v3846_v54, 0.0  ;;  %v3712_v32 = vpop.f32.mrb[12].mxu1  ;;  %v3825_v4 = vpop.f32.mrb[10].mxu0  ;;  %vm5334_vm2 = vcmp.lt.s32.totalorder %v2731_v43, 16  ;;  %vm5599_vm12 = vmmov %vm5588_vm3 }
 0x18a   : > { %v2821_v48 = vadd.f32 %v2820_v37, %v2819_v21  ;;  %v2822_v28 = vsel %vm5593_vm5, %v2796_v12, 0.0  ;;  %v2858_v51 = vmul.f32 %v2796_v12, %v2796_v12  ;;  %v3847_v16 = vadd.f32 %v3825_v4, %v3709_v18  ;;  %v1372_v34 = vpop.f32.mrb[13].mxu1  ;;  %v2370_v38 = vpop.f32.mrb[11].mxu0  ;;  %vm5360_vm15 = vmand %vm2678_vm1, %vm2660_vm6 }
 0x18b   : > { %v2882_v25 = vadd.f32 %v2881_v39, %v2880_v14  ;;  %v3848_v36 = vadd.f32 %v2370_v38, %v1362_v33  ;;  %vm5339_vm11 = vcmp.lt.s32.totalorder %v2730_v53, 16  ;;  %v2824_v8 = vsel %vm5599_vm12, %v2797_v29, 0.0  ;;  %vm5602_vm10 = vmmov %vm5588_vm3 }
 0x18c   : > { %v2823_v43 = vadd.f32 %v2822_v28, %v2821_v48  ;;  %v2883_v52 = vsel %vm5588_vm3, %v2858_v51, 0.0  ;;  %v2799_v42 = vsel %vm5271_vm4, %v3847_v16, 0.0  ;;  %v2885_v58 = vsel %vm5602_vm10, %v2859_v22, 0.0  ;;  %vm5603_vm13 = vmmov %vm5588_vm3 }
 0x18d   : > { %v2884_v46 = vadd.f32 %v2883_v52, %v2882_v25  ;;  %v2861_v50 = vmul.f32 %v2799_v42, %v2799_v42  ;;  %v2798_v57 = vsel %vm5277_vm8, %v3848_v36, 0.0  ;;  %v3715_v44 = vpop.f32.mrb[14].mxu1  ;;  %v3828_v59 = vpop.f32.mrb[12].mxu0  ;;  %v2733_v5 = vsel %vm5347_vm14, %v5283_v2, %v5239_v31  ;;  %vm5604_vm4 = vmmov %vm5588_vm3 }
 0x18e   : > { %v2825_v61 = vadd.f32 %v2824_v8, %v2823_v43  ;;  %v2826_v56 = vsel %vm5603_vm13, %v2798_v57, 0.0  ;;  %v2860_v62 = vmul.f32 %v2798_v57, %v2798_v57  ;;  %v3849_v63 = vadd.f32 %v3828_v59, %v3712_v32  ;;  %v1382_v35 = vpop.f32.mrb[15].mxu1  ;;  %v2380_v60 = vpop.f32.mrb[13].mxu0  ;;  %vm5605_vm8 = vmmov %vm5588_vm3 }
 0x18f   : > { %v2886_v3 = vadd.f32 %v2885_v58, %v2884_v46  ;;  %v3850_v47 = vadd.f32 %v2380_v60, %v1372_v34  ;;  %v2732_v41 = vsel %vm5360_vm15, %v2714_v13, %v5248_v27  ;;  %v2828_v15 = vsel %vm5604_vm4, %v2799_v42, 0.0  ;;  %vm5606_vm6 = vmmov %vm5588_vm3 }
 0x190   : > { %v2827_v49 = vadd.f32 %v2826_v56, %v2825_v61  ;;  %v2887_v6 = vsel %vm5605_vm8, %v2860_v62, 0.0  ;;  %v2801_v9 = vsel %vm5306_vm7, %v3849_v63, 0.0  ;;  %v2889_v11 = vsel %vm5606_vm6, %v2861_v50, 0.0  ;;  %vm5607_vm1 = vmmov %vm5588_vm3 }
 0x191   : > { %v2888_v18 = vadd.f32 %v2887_v6, %v2886_v3  ;;  %v2863_v10 = vmul.f32 %v2801_v9, %v2801_v9  ;;  %v2800_v19 = vsel %vm5312_vm9, %v3850_v47, 0.0  ;;  %v3718_v31 = vpop.f32.mrb[16].mxu1  ;;  %v3831_v2 = vpop.f32.mrb[14].mxu0  ;;  %vm5383_vm5 = vcmp.lt.s32.totalorder %v2733_v5, 16  ;;  %vm5612_vm9 = vmmov %vm5607_vm1 }
 0x192   : > { %v2829_v55 = vadd.f32 %v2828_v15, %v2827_v49  ;;  %v2830_v27 = vsel %vm5607_vm1, %v2800_v19, 0.0  ;;  %v2862_v17 = vmul.f32 %v2800_v19, %v2800_v19  ;;  %v3851_v24 = vadd.f32 %v3831_v2, %v3715_v44  ;;  %v1392_v33 = vpop.f32.mrb[17].mxu1  ;;  %v2390_v20 = vpop.f32.mrb[15].mxu0  ;;  %vm5613_vm0 = vmmov %vm5607_vm1 }
 0x193   : > { %v2890_v45 = vadd.f32 %v2889_v11, %v2888_v18  ;;  %v3852_v54 = vadd.f32 %v2390_v20, %v1382_v35  ;;  %vm5387_vm7 = vcmp.lt.s32.totalorder %v2732_v41, 16  ;;  %v2832_v30 = vsel %vm5612_vm9, %v2801_v9, 0.0  ;;  %vm5614_vm14 = vmmov %vm5613_vm0 }
 0x194   : > { %v2831_v37 = vadd.f32 %v2830_v27, %v2829_v55  ;;  %v2891_v21 = vsel %vm5613_vm0, %v2862_v17, 0.0  ;;  %v2803_v26 = vsel %vm5334_vm2, %v3851_v24, 0.0  ;;  %v2893_v29 = vsel %vm5614_vm14, %v2863_v10, 0.0  ;;  %vm5615_vm12 = vmmov %vm5613_vm0 }
 0x195   : > { %v2892_v39 = vadd.f32 %v2891_v21, %v2890_v45  ;;  %v2865_v14 = vmul.f32 %v2803_v26, %v2803_v26  ;;  %v2802_v22 = vsel %vm5339_vm11, %v3852_v54, 0.0  ;;  %v3834_v12 = vpop.f32.mrb[16].mxu0  ;;  %vm5616_vm3 = vmmov %vm5613_vm0  ;;  %vm2848_vm8 = vcmask 253952  }
 0x196   : > { %v2833_v32 = vadd.f32 %v2832_v30, %v2831_v37  ;;  %v2834_v4 = vsel %vm5615_vm12, %v2802_v22, 0.0  ;;  %v2864_v48 = vmul.f32 %v2802_v22, %v2802_v22  ;;  %v3853_v28 = vadd.f32 %v3834_v12, %v3718_v31  ;;  %v2400_v51 = vpop.f32.mrb[17].mxu0  ;;  %vm5617_vm2 = vmmov %vm5613_vm0 }
 0x197   : > { %v2894_v16 = vadd.f32 %v2893_v29, %v2892_v39  ;;  %v3854_v34 = vadd.f32 %v2400_v51, %v1392_v33  ;;  %v2836_v36 = vsel %vm5617_vm2, %v2803_v26, 0.0  ;;  %vm5618_vm15 = vmmov %vm5613_vm0 }
 0x198   : > { %v2835_v38 = vadd.f32 %v2834_v4, %v2833_v32  ;;  %v2895_v23 = vsel %vm5616_vm3, %v2864_v48, 0.0  ;;  %v2805_v25 = vsel %vm5383_vm5, %v3853_v28, 0.0  ;;  %v2897_v40 = vsel %vm5618_vm15, %v2865_v14, 0.0  ;;  %vm5619_vm11 = vmmov %vm5613_vm0 }
 0x199   : > { %v2896_v1 = vadd.f32 %v2895_v23, %v2894_v16  ;;  %v2804_v13 = vsel %vm5387_vm7, %v3854_v34, 0.0  ;;  %v2867_v8 = vmul.f32 %v2805_v25, %v2805_v25  ;;  %vm5620_vm10 = vmmov %vm5613_vm0 }
 0x19a   : > { %v2837_v43 = vadd.f32 %v2836_v36, %v2835_v38  ;;  %v2838_v52 = vsel %vm5619_vm11, %v2804_v13, 0.0  ;;  %v2866_v42 = vmul.f32 %v2804_v13, %v2804_v13  ;;  %vm5621_vm13 = vmmov %vm5613_vm0 }
 0x19b   : > { %v2898_v0 = vadd.f32 %v2897_v40, %v2896_v1  ;;  %v2840_v50 = vsel %vm5621_vm13, %v2805_v25, 0.0  ;;  %vm5622_vm4 = vmmov %vm5613_vm0 }
 0x19c   : > { %v2839_v58 = vadd.f32 %v2838_v52, %v2837_v43  ;;  %v2899_v46 = vsel %vm5620_vm10, %v2866_v42, 0.0  ;;  %v2901_v44 = vsel %vm5622_vm4, %v2867_v8, 0.0 }
 0x19d   : > { %v2900_v57 = vadd.f32 %v2899_v46, %v2898_v0 }
 0x19e   : > { %v2841_v59 = vadd.f32 %v2840_v50, %v2839_v58 }
 0x19f   : > { %v2902_v61 = vadd.f32 %v2901_v44, %v2900_v57 }
 0x1a0   : > { %v2842_v56 = vrot.slane %v2841_v59, 4 }
 0x1a1   : > { %v2903_v62 = vrot.slane %v2902_v61, 4 }
 0x1a2   : > { %v2843_v63 = vadd.f32 %v2842_v56, %v2841_v59 }
 0x1a3   : > { %v2904_v35 = vadd.f32 %v2903_v62, %v2902_v61 }
 0x1a4   : > { %v2844_v60 = vrot.slane %v2843_v63, 2 }
 0x1a5   : > { %v2905_v3 = vrot.slane %v2904_v35, 2 }
 0x1a6   : > { %v2845_v47 = vadd.f32 %v2844_v60, %v2843_v63 }
 0x1a7   : > { %v2906_v5 = vadd.f32 %v2905_v3, %v2904_v35 }
 0x1a8   : > { %v2846_v41 = vrot.slane %v2845_v47, 1 }
 0x1a9   : > { %v2907_v15 = vrot.slane %v2906_v5, 1 }
 0x1aa   : > { %v2847_v49 = vadd.f32 %v2846_v41, %v2845_v47 }
 0x1ab   : > { %v2908_v6 = vadd.f32 %v2907_v15, %v2906_v5 }
 0x1ac   : > { %2849 = vst.msk [vmem:[%s182_s5] sm:$0x1] %vm2848_vm8, %v2847_v49 }
 0x1ad   : > { %4107 = shalt.err (!%p4104_p6)
}
 0x1ae   : > { %s4108_s4 = scalar_lea.hbm %s5422_s10, 16  ;;  %s4112_s15 = scalar_lea.hbm %s5511_s2, 64 }
 0x1af   : > { %p4109_p7 = scmp.ne.s32.totalorder %s5422_s10, %s4108_s4  ;;  %p4113_p11 = scmp.lt.u32.totalorder %s5422_s10, %s5511_s2 }
 0x1b0   : > { %p4114_p12 = scmp.lt.u32.totalorder %s4112_s15, %s4108_s4  ;;  %p4116_p0 = scmp.lt.u32.totalorder %s4108_s4, %s5422_s10 }
 0x1b1   : > { %p4110_p9 = pnand %p4109_p7, %p4295_p3 }
 0x1b2   : > { %p4115_p13 = por %p4114_p12, %p4113_p11 }
 0x1b3   : > { %p4111_p10 = pneg %p4110_p9 }
 0x1b4   : > { %p4117_p1 = por %p4116_p0, %p4115_p13 }
 0x1b6   : > { %p4118_p2 = pnand %p4117_p1, %p4111_p10 }
 0x1b8   : > { %4121 = shalt.err (!%p4118_p2)
}
 0x1b9   : > { %4018 = dma.vmem_to_hbm [thread:$0]  (%p4295_p3), %s5424_s6, 16, %s5422_s10, %s2911_s21   ;;  %2909 = vst.msk [vmem:[%s188_s16] sm:$0x1] %vm2848_vm8, %v2908_v6 }
 0x1ba   : > { %s2915_s24 = scalar_lea.sflag [#allocation5], %s5412_s28  ;;  %s4122_s29 = scalar_lea.vmem %s5431_s7, 16 }
 0x1bb   : > { %p4123_p4 = scmp.ne.s32.totalorder %s5431_s7, %s4122_s29  ;;  %s4223_s8 = smov [#allocation4]  }
 0x1bc   : > { %s4126_s4 = sshll.u32 %s4223_s8, 4  ;;  %s4127_s4 = int_to_ptr.vmem [resolvable:$false] %s4126_s4 }
 0x1bd   : > { %p4124_p5 = pnand %p4123_p4, %p4295_p3  ;;  %s4128_s5 = scalar_lea.vmem %s4127_s4, 32 }
 0x1be   : > { %p4129_p7 = scmp.lt.s32.totalorder %s5431_s7, %s4127_s4  ;;  %p4130_p9 = scmp.lt.s32.totalorder %s4128_s5, %s4122_s29 }
 0x1bf   : > { %p4125_p6 = pneg %p4124_p5 }
 0x1c0   : > { %p4131_p10 = por %p4130_p9, %p4129_p7 }
 0x1c2   : > { %p4132_p11 = pnand %p4131_p10, %p4125_p6 }
 0x1c4   : > { %4135 = shalt.err (!%p4132_p11)
}
 0x1c5   : > { %s4136_s28 = scalar_lea.hbm %s5429_s20, 16  ;;  %s4140_s10 = scalar_lea.hbm %s5512_s3, 64 }
 0x1c6   : > { %p4137_p12 = scmp.ne.s32.totalorder %s5429_s20, %s4136_s28  ;;  %p4141_p1 = scmp.lt.u32.totalorder %s5429_s20, %s5512_s3 }
 0x1c7   : > { %p4142_p2 = scmp.lt.u32.totalorder %s4140_s10, %s4136_s28  ;;  %p4144_p5 = scmp.lt.u32.totalorder %s4136_s28, %s5429_s20 }
 0x1c8   : > { %p4138_p13 = pnand %p4137_p12, %p4295_p3 }
 0x1c9   : > { %p4143_p4 = por %p4142_p2, %p4141_p1 }
 0x1ca   : > { %p4139_p0 = pneg %p4138_p13 }
 0x1cb   : > { %p4145_p6 = por %p4144_p5, %p4143_p4 }
 0x1cd   : > { %p4146_p7 = pnand %p4145_p6, %p4139_p0 }
 0x1cf   : > { %4149 = shalt.err (!%p4146_p7)
}
 0x1d0   : > { %4019 = dma.vmem_to_hbm [thread:$0]  (%p4295_p3), %s5431_s7, 16, %s5429_s20, %s2915_s24  }
 0x1d1 PF: > { %p4029_p9 = scmp.ge.s32.totalorder %s4220_s19, 2  ;;  %s2956_s15 = sand.u32 1, %s4192_s12  }
 0x1d2   : > { %s2957_s11 = scalar_lea.sflag [#allocation3], %s2956_s15 }
 0x1d3   : > { %p4023_p10 = pnand %p4029_p9, %p4304_p8 }
 0x1d5   : > { %4183 = dma.done.wait (!%p4023_p10), %s2957_s11, 16  }
 0x1d6   : > { %4185 = vsyncadd (!%p4023_p10), %s2957_s11, 4294967280  ;;  %s2965_s27 = scalar_lea.sflag [#allocation5], %s2956_s15 }
 0x1d7   : > { %4187 = dma.done.wait (!%p4023_p10), %s2965_s27, 16  }
 0x1d8   : > { %4189 = vsyncadd (!%p4023_p10), %s2965_s27, 4294967280  ;;  %s20_s19 = sadd.s32 1, %s4220_s19   ;;  %s5623_s12 = smov %s4196_s13 }
 0x1d9   : > { %p17_p11 = scmp.ge.s32.totalorder %s20_s19, 6   ;;  %s5624_s13 = smov %s4200_s14 }
 0x1da   : > { %s5625_s14 = smov %s4313_s30  ;;  %s5626_s15 = smov %s4212_s17 }
 0x1db   : > { %s5627_s16 = smov %s4216_s18  ;;  %s5628_s17 = smov %s5631_s22 }
 0x1dc   : > { %s5629_s18 = smov %s5635_s23  ;;  %19 = sbr.rel (!%p17_p11) target bundleno = 7 (0x7), region = 97 }
 0x1e3   :  { %2969 = vsyncpa [#allocation3], 1 }
 0x1e4   :  { %2971 = vsyncpa [#allocation3 + $0x1], 1 }
 0x1e5   :  { %2972 = vsyncpa [#allocation5], 1 }
 0x1e6   :  { %2974 = vsyncpa [#allocation5 + $0x1], 1 }

</bundles_post_ra>
